<compile_context>
chip_gen: v7x
topology: tpu7x:2x2x1
jax: 0.10.0
libtpu: 0.0.40
codegen_flags: <defaults>
</compile_context>

<pallas_src>
import math

import jax
import jax.numpy as jnp
from jax.experimental import pallas as pl
from jax.experimental.pallas import tpu as pltpu

# ---- small synthetic BERT config ----
B, S, H = 2, 8, 32
BS = B * S
NUM_HEADS, HEAD_DIM = 2, 16          # NUM_HEADS * HEAD_DIM == H
INTER = 64                           # FFN intermediate size
NUM_LAYERS = 2
VOCAB = 50
TYPE_VOCAB = 2
MAX_POS = 16
N_EMOTIONS = 6
OUT_PAD = 128                        # lane-dense classifier output width
LN_EPS = 1e-12


# ---------------- in-kernel helpers ----------------
def _layer_norm(x, g, b):
    mean = jnp.mean(x, axis=-1, keepdims=True)
    var = jnp.mean(jnp.square(x - mean), axis=-1, keepdims=True)
    return (x - mean) * jax.lax.rsqrt(var + LN_EPS) * g + b


def _gelu(x):
    # exact (erf-based) GELU, matching HF BERT numerics.
    # (tanh approximation would offload to EUP but changes numerics slightly)
    return 0.5 * x * (1.0 + jax.lax.erf(x * (1.0 / math.sqrt(2.0))))


# ---------------- fused full-forward kernel ----------------
def bert_kernel(we_ref, te_ref, pe_ref, bias_ref,
                eg_ref, eb_ref,
                wqkv_ref, bqkv_ref, wo_ref, bo_ref, l1g_ref, l1b_ref,
                wi_ref, bi_ref, wo2_ref, bo2_ref, l2g_ref, l2b_ref,
                wp_ref, bp_ref, wout_ref, bout_ref,
                o_ref):
    # --- embeddings sum + LayerNorm, flattened to (B*S, H) ---
    pos = jnp.concatenate([pe_ref[...]] * B, axis=0)          # (B*S, H)
    x = we_ref[...] + te_ref[...] + pos
    x = _layer_norm(x, eg_ref[...], eb_ref[...])               # (B*S, H)

    bias = bias_ref[...]                                       # (B, 1, S)
    scale = 1.0 / math.sqrt(HEAD_DIM)

    # --- encoder layers (static loop, all weights resident in VMEM) ---
    for l in range(NUM_LAYERS):
        # fused QKV projection: one (B*S, H) x (H, 3H) matmul
        qkv = (jnp.dot(x, wqkv_ref[l], preferred_element_type=jnp.float32)
               + bqkv_ref[l])                                  # (B*S, 3H)
        q3 = qkv[:, 0:H].reshape(B, S, H)
        k3 = qkv[:, H:2 * H].reshape(B, S, H)
        v3 = qkv[:, 2 * H:3 * H].reshape(B, S, H)

        ctx_heads = []
        for h in range(NUM_HEADS):                             # static, 2 iters
            sl = slice(h * HEAD_DIM, (h + 1) * HEAD_DIM)
            s = jnp.einsum('bqd,bkd->bqk', q3[:, :, sl], k3[:, :, sl],
                           preferred_element_type=jnp.float32) * scale + bias
            s = s - jnp.max(s, axis=-1, keepdims=True)
            p = jnp.exp(s)
            p = p / jnp.sum(p, axis=-1, keepdims=True)
            ctx_heads.append(jnp.einsum('bqk,bkd->bqd', p, v3[:, :, sl],
                                        preferred_element_type=jnp.float32))
        ctx = jnp.concatenate(ctx_heads, axis=-1).reshape(BS, H)

        attn = (jnp.dot(ctx, wo_ref[l], preferred_element_type=jnp.float32)
                + bo_ref[l])
        h1 = _layer_norm(x + attn, l1g_ref[l], l1b_ref[l])

        inter = _gelu(jnp.dot(h1, wi_ref[l],
                              preferred_element_type=jnp.float32) + bi_ref[l])
        ffn = (jnp.dot(inter, wo2_ref[l], preferred_element_type=jnp.float32)
               + bo2_ref[l])
        x = _layer_norm(h1 + ffn, l2g_ref[l], l2b_ref[l])

    # --- pooler (tanh on CLS) + classifier, lane-dense padded output ---
    cls = jnp.concatenate([x[b * S:b * S + 1, :] for b in range(B)], axis=0)
    pooled = jnp.tanh(
        jnp.dot(cls, wp_ref[...], preferred_element_type=jnp.float32)
        + bp_ref[...])
    # nn.Dropout(0.3) on the pooled output is identity at inference time.
    o_ref[...] = (jnp.dot(pooled, wout_ref[...],
                          preferred_element_type=jnp.float32)
                  + bout_ref[...])                             # (B, OUT_PAD)


def bert_forward_fused(word_e, type_e, pos_e, attn_bias, p, wout_p, bout_p):
    args = (word_e, type_e, pos_e, attn_bias,
            p["emb_ln_g"], p["emb_ln_b"],
            p["wqkv"], p["bqkv"], p["wo"], p["bo"], p["ln1g"], p["ln1b"],
            p["wi"], p["bi"], p["wo2"], p["bo2"], p["ln2g"], p["ln2b"],
            p["wp"], p["bp"], wout_p, bout_p)
    vm = pl.BlockSpec(memory_space=pltpu.MemorySpace.VMEM)
    return pl.pallas_call(
        bert_kernel,
        out_shape=jax.ShapeDtypeStruct((B, OUT_PAD), jnp.float32),
        in_specs=[vm] * len(args),
        out_specs=vm,
    )(*args)


# ---------------- parameter init (deterministic, synthetic) ----------------
def init_params(key):
    def nrm(k, shape):
        return jax.random.normal(k, shape, jnp.float32) * 0.02

    keys = iter(jax.random.split(key, 32))
    L = NUM_LAYERS
    p = {
        "word_emb": nrm(next(keys), (VOCAB, H)),
        "pos_emb": nrm(next(keys), (MAX_POS, H)),
        "type_emb": nrm(next(keys), (TYPE_VOCAB, H)),
        "emb_ln_g": jnp.ones((1, H), jnp.float32),
        "emb_ln_b": jnp.zeros((1, H), jnp.float32),
        # stacked, QKV-fused layer weights
        "wqkv": nrm(next(keys), (L, H, 3 * H)),
        "bqkv": jnp.zeros((L, 1, 3 * H), jnp.float32),
        "wo": nrm(next(keys), (L, H, H)),
        "bo": jnp.zeros((L, 1, H), jnp.float32),
        "ln1g": jnp.ones((L, 1, H), jnp.float32),
        "ln1b": jnp.zeros((L, 1, H), jnp.float32),
        "wi": nrm(next(keys), (L, H, INTER)),
        "bi": jnp.zeros((L, 1, INTER), jnp.float32),
        "wo2": nrm(next(keys), (L, INTER, H)),
        "bo2": jnp.zeros((L, 1, H), jnp.float32),
        "ln2g": jnp.ones((L, 1, H), jnp.float32),
        "ln2b": jnp.zeros((L, 1, H), jnp.float32),
        # pooler + classifier
        "wp": nrm(next(keys), (H, H)),
        "bp": jnp.zeros((1, H), jnp.float32),
        "wout": nrm(next(keys), (H, N_EMOTIONS)),
        "bout": jnp.zeros((1, N_EMOTIONS), jnp.float32),
    }
    return p


# ---------------- full forward (glue + fused kernel) ----------------
def bert_go_emotion_forward(params, ids, mask, token_type_ids):
    # Embedding gathers are data-dependent -> plain JAX glue, flattened rows.
    word_e = jnp.take(params["word_emb"], ids.reshape(-1), axis=0)      # (B*S,H)
    type_e = jnp.take(params["type_emb"], token_type_ids.reshape(-1),
                      axis=0)                                           # (B*S,H)
    pos_e = params["pos_emb"][:S]                                       # (S, H)

    # additive attention bias, (B, 1, S); 1.0 = keep
    attn_bias = (1.0 - mask.astype(jnp.float32)).reshape(B, 1, S) * (-1e9)

    # zero-pad classifier to a lane-dense 128-wide output block
    wout_p = jnp.pad(params["wout"], ((0, 0), (0, OUT_PAD - N_EMOTIONS)))
    bout_p = jnp.pad(params["bout"], ((0, 0), (0, OUT_PAD - N_EMOTIONS)))

    out_pad = bert_forward_fused(word_e, type_e, pos_e, attn_bias,
                                 params, wout_p, bout_p)                # (B,128)
    return out_pad[:, :N_EMOTIONS]                                      # (B, E)


if __name__ == "__main__":
    key = jax.random.PRNGKey(0)
    k_ids, k_types, k_params = jax.random.split(key, 3)

    ids = jax.random.randint(k_ids, (B, S), 0, VOCAB, dtype=jnp.int32)
    token_type_ids = jax.random.randint(k_types, (B, S), 0, TYPE_VOCAB,
                                        dtype=jnp.int32)
    mask = jnp.ones((B, S), jnp.int32).at[1, 6:].set(0)  # second seq padded

    params = init_params(k_params)

    out = bert_go_emotion_forward(params, ids, mask, token_type_ids)
    out = jax.block_until_ready(out)
    assert out.shape == (B, N_EMOTIONS) and out.dtype == jnp.float32
    assert bool(jnp.all(jnp.isfinite(out)))
    print("KERNEL_OK")
</pallas_src>

<mosaic_0001>
module attributes {stable_mosaic.version = 11 : i64} {
  func.func @bert_kernel(%arg0: memref<16x32xf32, #tpu.memory_space<vmem>>, %arg1: memref<16x32xf32, #tpu.memory_space<vmem>>, %arg2: memref<8x32xf32, #tpu.memory_space<vmem>>, %arg3: memref<2x1x8xf32, #tpu.memory_space<vmem>>, %arg4: memref<1x32xf32, #tpu.memory_space<vmem>>, %arg5: memref<1x32xf32, #tpu.memory_space<vmem>>, %arg6: memref<2x32x96xf32, #tpu.memory_space<vmem>>, %arg7: memref<2x1x96xf32, #tpu.memory_space<vmem>>, %arg8: memref<2x32x32xf32, #tpu.memory_space<vmem>>, %arg9: memref<2x1x32xf32, #tpu.memory_space<vmem>>, %arg10: memref<2x1x32xf32, #tpu.memory_space<vmem>>, %arg11: memref<2x1x32xf32, #tpu.memory_space<vmem>>, %arg12: memref<2x32x64xf32, #tpu.memory_space<vmem>>, %arg13: memref<2x1x64xf32, #tpu.memory_space<vmem>>, %arg14: memref<2x64x32xf32, #tpu.memory_space<vmem>>, %arg15: memref<2x1x32xf32, #tpu.memory_space<vmem>>, %arg16: memref<2x1x32xf32, #tpu.memory_space<vmem>>, %arg17: memref<2x1x32xf32, #tpu.memory_space<vmem>>, %arg18: memref<32x32xf32, #tpu.memory_space<vmem>>, %arg19: memref<1x32xf32, #tpu.memory_space<vmem>>, %arg20: memref<32x128xf32, #tpu.memory_space<vmem>>, %arg21: memref<1x128xf32, #tpu.memory_space<vmem>>, %arg22: memref<2x128xf32, #tpu.memory_space<vmem>>) attributes {dimension_semantics = [], scalar_prefetch = 0 : i64, scratch_operands = 0 : i64, tpu.core_type = #tpu.core_type<tc>} {
    %c0 = arith.constant 0 : index
    %c0_0 = arith.constant 0 : index
    %0 = vector.load %arg2[%c0, %c0_0] : memref<8x32xf32, #tpu.memory_space<vmem>>, vector<8x32xf32>
    %1 = tpu.concatenate %0, %0 in 0 : vector<8x32xf32>, vector<8x32xf32> -> vector<16x32xf32>
    %c0_1 = arith.constant 0 : index
    %c0_2 = arith.constant 0 : index
    %2 = vector.load %arg0[%c0_1, %c0_2] : memref<16x32xf32, #tpu.memory_space<vmem>>, vector<16x32xf32>
    %c0_3 = arith.constant 0 : index
    %c0_4 = arith.constant 0 : index
    %3 = vector.load %arg1[%c0_3, %c0_4] : memref<16x32xf32, #tpu.memory_space<vmem>>, vector<16x32xf32>
    %4 = arith.addf %2, %3 : vector<16x32xf32>
    %5 = arith.addf %4, %1 : vector<16x32xf32>
    %c0_5 = arith.constant 0 : index
    %c0_6 = arith.constant 0 : index
    %6 = vector.load %arg4[%c0_5, %c0_6] : memref<1x32xf32, #tpu.memory_space<vmem>>, vector<1x32xf32>
    %c0_7 = arith.constant 0 : index
    %c0_8 = arith.constant 0 : index
    %7 = vector.load %arg5[%c0_7, %c0_8] : memref<1x32xf32, #tpu.memory_space<vmem>>, vector<1x32xf32>
    %cst = arith.constant dense<0.000000e+00> : vector<16xf32>
    %8 = vector.multi_reduction <add>, %5, %cst [1] : vector<16x32xf32> to vector<16xf32>
    %9 = vector.shape_cast %8 : vector<16xf32> to vector<16x1xf32>
    %cst_9 = arith.constant 3.200000e+01 : f32
    %10 = vector.broadcast %cst_9 : f32 to vector<16x1xf32>
    %11 = arith.divf %9, %10 : vector<16x1xf32>
    %12 = vector.broadcast %11 : vector<16x1xf32> to vector<16x32xf32>
    %13 = arith.subf %5, %12 : vector<16x32xf32>
    %14 = arith.mulf %13, %13 : vector<16x32xf32>
    %cst_10 = arith.constant dense<0.000000e+00> : vector<16xf32>
    %15 = vector.multi_reduction <add>, %14, %cst_10 [1] : vector<16x32xf32> to vector<16xf32>
    %16 = vector.shape_cast %15 : vector<16xf32> to vector<16x1xf32>
    %cst_11 = arith.constant 3.200000e+01 : f32
    %17 = vector.broadcast %cst_11 : f32 to vector<16x1xf32>
    %18 = arith.divf %16, %17 : vector<16x1xf32>
    %19 = vector.broadcast %11 : vector<16x1xf32> to vector<16x32xf32>
    %20 = arith.subf %5, %19 : vector<16x32xf32>
    %cst_12 = arith.constant 9.99999996E-13 : f32
    %21 = vector.broadcast %cst_12 : f32 to vector<16x1xf32>
    %22 = arith.addf %18, %21 : vector<16x1xf32>
    %23 = math.rsqrt %22 : vector<16x1xf32>
    %24 = vector.broadcast %23 : vector<16x1xf32> to vector<16x32xf32>
    %25 = arith.mulf %20, %24 : vector<16x32xf32>
    %26 = vector.broadcast %6 : vector<1x32xf32> to vector<16x32xf32>
    %27 = arith.mulf %25, %26 : vector<16x32xf32>
    %28 = vector.broadcast %7 : vector<1x32xf32> to vector<16x32xf32>
    %29 = arith.addf %27, %28 : vector<16x32xf32>
    %c0_13 = arith.constant 0 : index
    %c0_14 = arith.constant 0 : index
    %c0_15 = arith.constant 0 : index
    %30 = vector.load %arg3[%c0_13, %c0_14, %c0_15] : memref<2x1x8xf32, #tpu.memory_space<vmem>>, vector<2x1x8xf32>
    %c0_16 = arith.constant 0 : index
    %c0_17 = arith.constant 0 : index
    %c0_18 = arith.constant 0 : index
    %31 = vector.load %arg6[%c0_16, %c0_17, %c0_18] : memref<2x32x96xf32, #tpu.memory_space<vmem>>, vector<1x32x96xf32>
    %32 = vector.shape_cast %31 : vector<1x32x96xf32> to vector<32x96xf32>
    %cst_19 = arith.constant dense<0.000000e+00> : vector<16x96xf32>
    %33 = tpu.matmul %29, %32, %cst_19 {dimension_numbers = #tpu.dot_dimension_numbers<[1], [0], [0], [1], [0, 0, 1, 1], [], []>} : vector<16x32xf32>, vector<32x96xf32>, vector<16x96xf32> -> vector<16x96xf32>
    %c0_20 = arith.constant 0 : index
    %c0_21 = arith.constant 0 : index
    %c0_22 = arith.constant 0 : index
    %34 = vector.load %arg7[%c0_20, %c0_21, %c0_22] : memref<2x1x96xf32, #tpu.memory_space<vmem>>, vector<1x1x96xf32>
    %35 = vector.shape_cast %34 : vector<1x1x96xf32> to vector<1x96xf32>
    %36 = vector.broadcast %35 : vector<1x96xf32> to vector<16x96xf32>
    %37 = arith.addf %33, %36 : vector<16x96xf32>
    %38 = vector.extract_strided_slice %37 {offsets = [0, 0], sizes = [16, 32], strides = [1, 1]} : vector<16x96xf32> to vector<16x32xf32>
    %39 = vector.shape_cast %38 : vector<16x32xf32> to vector<2x8x32xf32>
    %40 = vector.extract_strided_slice %37 {offsets = [0, 32], sizes = [16, 32], strides = [1, 1]} : vector<16x96xf32> to vector<16x32xf32>
    %41 = vector.shape_cast %40 : vector<16x32xf32> to vector<2x8x32xf32>
    %42 = vector.extract_strided_slice %37 {offsets = [0, 64], sizes = [16, 32], strides = [1, 1]} : vector<16x96xf32> to vector<16x32xf32>
    %43 = vector.shape_cast %42 : vector<16x32xf32> to vector<2x8x32xf32>
    %44 = vector.extract_strided_slice %39 {offsets = [0, 0, 0], sizes = [2, 8, 16], strides = [1, 1, 1]} : vector<2x8x32xf32> to vector<2x8x16xf32>
    %45 = vector.extract_strided_slice %41 {offsets = [0, 0, 0], sizes = [2, 8, 16], strides = [1, 1, 1]} : vector<2x8x32xf32> to vector<2x8x16xf32>
    "tpu.trace_start"() <{level = 10 : i32, message = "bqd,bkd->bqk"}> : () -> ()
    %cst_23 = arith.constant dense<0.000000e+00> : vector<2x8x8xf32>
    %46 = tpu.matmul %44, %45, %cst_23 {dimension_numbers = #tpu.dot_dimension_numbers<[2], [2], [1], [1], [0, 0, 0, 1, 1, 1], [0], [0]>} : vector<2x8x16xf32>, vector<2x8x16xf32>, vector<2x8x8xf32> -> vector<2x8x8xf32>
    "tpu.trace_stop"() : () -> ()
    %cst_24 = arith.constant 2.500000e-01 : f32
    %47 = vector.broadcast %cst_24 : f32 to vector<2x8x8xf32>
    %48 = arith.mulf %46, %47 : vector<2x8x8xf32>
    %49 = vector.broadcast %30 : vector<2x1x8xf32> to vector<2x8x8xf32>
    %50 = arith.addf %48, %49 : vector<2x8x8xf32>
    %cst_25 = arith.constant dense<0xFF800000> : vector<2x8xf32>
    %51 = vector.multi_reduction <maximumf>, %50, %cst_25 [2] : vector<2x8x8xf32> to vector<2x8xf32>
    %52 = vector.shape_cast %51 : vector<2x8xf32> to vector<2x8x1xf32>
    %53 = vector.broadcast %52 : vector<2x8x1xf32> to vector<2x8x8xf32>
    %54 = arith.subf %50, %53 : vector<2x8x8xf32>
    %55 = math.exp %54 : vector<2x8x8xf32>
    %cst_26 = arith.constant dense<0.000000e+00> : vector<2x8xf32>
    %56 = vector.multi_reduction <add>, %55, %cst_26 [2] : vector<2x8x8xf32> to vector<2x8xf32>
    %57 = vector.shape_cast %56 : vector<2x8xf32> to vector<2x8x1xf32>
    %58 = vector.broadcast %57 : vector<2x8x1xf32> to vector<2x8x8xf32>
    %59 = arith.divf %55, %58 : vector<2x8x8xf32>
    %60 = vector.extract_strided_slice %43 {offsets = [0, 0, 0], sizes = [2, 8, 16], strides = [1, 1, 1]} : vector<2x8x32xf32> to vector<2x8x16xf32>
    "tpu.trace_start"() <{level = 10 : i32, message = "bqk,bkd->bqd"}> : () -> ()
    %cst_27 = arith.constant dense<0.000000e+00> : vector<2x8x16xf32>
    %61 = tpu.matmul %59, %60, %cst_27 {dimension_numbers = #tpu.dot_dimension_numbers<[2], [1], [1], [2], [0, 0, 0, 1, 1, 2], [0], [0]>} : vector<2x8x8xf32>, vector<2x8x16xf32>, vector<2x8x16xf32> -> vector<2x8x16xf32>
    "tpu.trace_stop"() : () -> ()
    %62 = vector.extract_strided_slice %39 {offsets = [0, 0, 16], sizes = [2, 8, 16], strides = [1, 1, 1]} : vector<2x8x32xf32> to vector<2x8x16xf32>
    %63 = vector.extract_strided_slice %41 {offsets = [0, 0, 16], sizes = [2, 8, 16], strides = [1, 1, 1]} : vector<2x8x32xf32> to vector<2x8x16xf32>
    "tpu.trace_start"() <{level = 10 : i32, message = "bqd,bkd->bqk"}> : () -> ()
    %cst_28 = arith.constant dense<0.000000e+00> : vector<2x8x8xf32>
    %64 = tpu.matmul %62, %63, %cst_28 {dimension_numbers = #tpu.dot_dimension_numbers<[2], [2], [1], [1], [0, 0, 0, 1, 1, 1], [0], [0]>} : vector<2x8x16xf32>, vector<2x8x16xf32>, vector<2x8x8xf32> -> vector<2x8x8xf32>
    "tpu.trace_stop"() : () -> ()
    %cst_29 = arith.constant 2.500000e-01 : f32
    %65 = vector.broadcast %cst_29 : f32 to vector<2x8x8xf32>
    %66 = arith.mulf %64, %65 : vector<2x8x8xf32>
    %67 = vector.broadcast %30 : vector<2x1x8xf32> to vector<2x8x8xf32>
    %68 = arith.addf %66, %67 : vector<2x8x8xf32>
    %cst_30 = arith.constant dense<0xFF800000> : vector<2x8xf32>
    %69 = vector.multi_reduction <maximumf>, %68, %cst_30 [2] : vector<2x8x8xf32> to vector<2x8xf32>
    %70 = vector.shape_cast %69 : vector<2x8xf32> to vector<2x8x1xf32>
    %71 = vector.broadcast %70 : vector<2x8x1xf32> to vector<2x8x8xf32>
    %72 = arith.subf %68, %71 : vector<2x8x8xf32>
    %73 = math.exp %72 : vector<2x8x8xf32>
    %cst_31 = arith.constant dense<0.000000e+00> : vector<2x8xf32>
    %74 = vector.multi_reduction <add>, %73, %cst_31 [2] : vector<2x8x8xf32> to vector<2x8xf32>
    %75 = vector.shape_cast %74 : vector<2x8xf32> to vector<2x8x1xf32>
    %76 = vector.broadcast %75 : vector<2x8x1xf32> to vector<2x8x8xf32>
    %77 = arith.divf %73, %76 : vector<2x8x8xf32>
    %78 = vector.extract_strided_slice %43 {offsets = [0, 0, 16], sizes = [2, 8, 16], strides = [1, 1, 1]} : vector<2x8x32xf32> to vector<2x8x16xf32>
    "tpu.trace_start"() <{level = 10 : i32, message = "bqk,bkd->bqd"}> : () -> ()
    %cst_32 = arith.constant dense<0.000000e+00> : vector<2x8x16xf32>
    %79 = tpu.matmul %77, %78, %cst_32 {dimension_numbers = #tpu.dot_dimension_numbers<[2], [1], [1], [2], [0, 0, 0, 1, 1, 2], [0], [0]>} : vector<2x8x8xf32>, vector<2x8x16xf32>, vector<2x8x16xf32> -> vector<2x8x16xf32>
    "tpu.trace_stop"() : () -> ()
    %80 = tpu.concatenate %61, %79 in 2 : vector<2x8x16xf32>, vector<2x8x16xf32> -> vector<2x8x32xf32>
    %81 = vector.shape_cast %80 : vector<2x8x32xf32> to vector<16x32xf32>
    %c0_33 = arith.constant 0 : index
    %c0_34 = arith.constant 0 : index
    %c0_35 = arith.constant 0 : index
    %82 = vector.load %arg8[%c0_33, %c0_34, %c0_35] : memref<2x32x32xf32, #tpu.memory_space<vmem>>, vector<1x32x32xf32>
    %83 = vector.shape_cast %82 : vector<1x32x32xf32> to vector<32x32xf32>
    %cst_36 = arith.constant dense<0.000000e+00> : vector<16x32xf32>
    %84 = tpu.matmul %81, %83, %cst_36 {dimension_numbers = #tpu.dot_dimension_numbers<[1], [0], [0], [1], [0, 0, 1, 1], [], []>} : vector<16x32xf32>, vector<32x32xf32>, vector<16x32xf32> -> vector<16x32xf32>
    %c0_37 = arith.constant 0 : index
    %c0_38 = arith.constant 0 : index
    %c0_39 = arith.constant 0 : index
    %85 = vector.load %arg9[%c0_37, %c0_38, %c0_39] : memref<2x1x32xf32, #tpu.memory_space<vmem>>, vector<1x1x32xf32>
    %86 = vector.shape_cast %85 : vector<1x1x32xf32> to vector<1x32xf32>
    %87 = vector.broadcast %86 : vector<1x32xf32> to vector<16x32xf32>
    %88 = arith.addf %84, %87 : vector<16x32xf32>
    %89 = arith.addf %29, %88 : vector<16x32xf32>
    %c0_40 = arith.constant 0 : index
    %c0_41 = arith.constant 0 : index
    %c0_42 = arith.constant 0 : index
    %90 = vector.load %arg10[%c0_40, %c0_41, %c0_42] : memref<2x1x32xf32, #tpu.memory_space<vmem>>, vector<1x1x32xf32>
    %91 = vector.shape_cast %90 : vector<1x1x32xf32> to vector<1x32xf32>
    %c0_43 = arith.constant 0 : index
    %c0_44 = arith.constant 0 : index
    %c0_45 = arith.constant 0 : index
    %92 = vector.load %arg11[%c0_43, %c0_44, %c0_45] : memref<2x1x32xf32, #tpu.memory_space<vmem>>, vector<1x1x32xf32>
    %93 = vector.shape_cast %92 : vector<1x1x32xf32> to vector<1x32xf32>
    %cst_46 = arith.constant dense<0.000000e+00> : vector<16xf32>
    %94 = vector.multi_reduction <add>, %89, %cst_46 [1] : vector<16x32xf32> to vector<16xf32>
    %95 = vector.shape_cast %94 : vector<16xf32> to vector<16x1xf32>
    %cst_47 = arith.constant 3.200000e+01 : f32
    %96 = vector.broadcast %cst_47 : f32 to vector<16x1xf32>
    %97 = arith.divf %95, %96 : vector<16x1xf32>
    %98 = vector.broadcast %97 : vector<16x1xf32> to vector<16x32xf32>
    %99 = arith.subf %89, %98 : vector<16x32xf32>
    %100 = arith.mulf %99, %99 : vector<16x32xf32>
    %cst_48 = arith.constant dense<0.000000e+00> : vector<16xf32>
    %101 = vector.multi_reduction <add>, %100, %cst_48 [1] : vector<16x32xf32> to vector<16xf32>
    %102 = vector.shape_cast %101 : vector<16xf32> to vector<16x1xf32>
    %cst_49 = arith.constant 3.200000e+01 : f32
    %103 = vector.broadcast %cst_49 : f32 to vector<16x1xf32>
    %104 = arith.divf %102, %103 : vector<16x1xf32>
    %105 = vector.broadcast %97 : vector<16x1xf32> to vector<16x32xf32>
    %106 = arith.subf %89, %105 : vector<16x32xf32>
    %cst_50 = arith.constant 9.99999996E-13 : f32
    %107 = vector.broadcast %cst_50 : f32 to vector<16x1xf32>
    %108 = arith.addf %104, %107 : vector<16x1xf32>
    %109 = math.rsqrt %108 : vector<16x1xf32>
    %110 = vector.broadcast %109 : vector<16x1xf32> to vector<16x32xf32>
    %111 = arith.mulf %106, %110 : vector<16x32xf32>
    %112 = vector.broadcast %91 : vector<1x32xf32> to vector<16x32xf32>
    %113 = arith.mulf %111, %112 : vector<16x32xf32>
    %114 = vector.broadcast %93 : vector<1x32xf32> to vector<16x32xf32>
    %115 = arith.addf %113, %114 : vector<16x32xf32>
    %c0_51 = arith.constant 0 : index
    %c0_52 = arith.constant 0 : index
    %c0_53 = arith.constant 0 : index
    %116 = vector.load %arg12[%c0_51, %c0_52, %c0_53] : memref<2x32x64xf32, #tpu.memory_space<vmem>>, vector<1x32x64xf32>
    %117 = vector.shape_cast %116 : vector<1x32x64xf32> to vector<32x64xf32>
    %cst_54 = arith.constant dense<0.000000e+00> : vector<16x64xf32>
    %118 = tpu.matmul %115, %117, %cst_54 {dimension_numbers = #tpu.dot_dimension_numbers<[1], [0], [0], [1], [0, 0, 1, 1], [], []>} : vector<16x32xf32>, vector<32x64xf32>, vector<16x64xf32> -> vector<16x64xf32>
    %c0_55 = arith.constant 0 : index
    %c0_56 = arith.constant 0 : index
    %c0_57 = arith.constant 0 : index
    %119 = vector.load %arg13[%c0_55, %c0_56, %c0_57] : memref<2x1x64xf32, #tpu.memory_space<vmem>>, vector<1x1x64xf32>
    %120 = vector.shape_cast %119 : vector<1x1x64xf32> to vector<1x64xf32>
    %121 = vector.broadcast %120 : vector<1x64xf32> to vector<16x64xf32>
    %122 = arith.addf %118, %121 : vector<16x64xf32>
    %cst_58 = arith.constant 5.000000e-01 : f32
    %123 = vector.broadcast %cst_58 : f32 to vector<16x64xf32>
    %124 = arith.mulf %123, %122 : vector<16x64xf32>
    %cst_59 = arith.constant 0.707106769 : f32
    %125 = vector.broadcast %cst_59 : f32 to vector<16x64xf32>
    %126 = arith.mulf %122, %125 : vector<16x64xf32>
    %127 = math.erf %126 : vector<16x64xf32>
    %cst_60 = arith.constant 1.000000e+00 : f32
    %128 = vector.broadcast %cst_60 : f32 to vector<16x64xf32>
    %129 = arith.addf %128, %127 : vector<16x64xf32>
    %130 = arith.mulf %124, %129 : vector<16x64xf32>
    %c0_61 = arith.constant 0 : index
    %c0_62 = arith.constant 0 : index
    %c0_63 = arith.constant 0 : index
    %131 = vector.load %arg14[%c0_61, %c0_62, %c0_63] : memref<2x64x32xf32, #tpu.memory_space<vmem>>, vector<1x64x32xf32>
    %132 = vector.shape_cast %131 : vector<1x64x32xf32> to vector<64x32xf32>
    %cst_64 = arith.constant dense<0.000000e+00> : vector<16x32xf32>
    %133 = tpu.matmul %130, %132, %cst_64 {dimension_numbers = #tpu.dot_dimension_numbers<[1], [0], [0], [1], [0, 0, 1, 1], [], []>} : vector<16x64xf32>, vector<64x32xf32>, vector<16x32xf32> -> vector<16x32xf32>
    %c0_65 = arith.constant 0 : index
    %c0_66 = arith.constant 0 : index
    %c0_67 = arith.constant 0 : index
    %134 = vector.load %arg15[%c0_65, %c0_66, %c0_67] : memref<2x1x32xf32, #tpu.memory_space<vmem>>, vector<1x1x32xf32>
    %135 = vector.shape_cast %134 : vector<1x1x32xf32> to vector<1x32xf32>
    %136 = vector.broadcast %135 : vector<1x32xf32> to vector<16x32xf32>
    %137 = arith.addf %133, %136 : vector<16x32xf32>
    %138 = arith.addf %115, %137 : vector<16x32xf32>
    %c0_68 = arith.constant 0 : index
    %c0_69 = arith.constant 0 : index
    %c0_70 = arith.constant 0 : index
    %139 = vector.load %arg16[%c0_68, %c0_69, %c0_70] : memref<2x1x32xf32, #tpu.memory_space<vmem>>, vector<1x1x32xf32>
    %140 = vector.shape_cast %139 : vector<1x1x32xf32> to vector<1x32xf32>
    %c0_71 = arith.constant 0 : index
    %c0_72 = arith.constant 0 : index
    %c0_73 = arith.constant 0 : index
    %141 = vector.load %arg17[%c0_71, %c0_72, %c0_73] : memref<2x1x32xf32, #tpu.memory_space<vmem>>, vector<1x1x32xf32>
    %142 = vector.shape_cast %141 : vector<1x1x32xf32> to vector<1x32xf32>
    %cst_74 = arith.constant dense<0.000000e+00> : vector<16xf32>
    %143 = vector.multi_reduction <add>, %138, %cst_74 [1] : vector<16x32xf32> to vector<16xf32>
    %144 = vector.shape_cast %143 : vector<16xf32> to vector<16x1xf32>
    %cst_75 = arith.constant 3.200000e+01 : f32
    %145 = vector.broadcast %cst_75 : f32 to vector<16x1xf32>
    %146 = arith.divf %144, %145 : vector<16x1xf32>
    %147 = vector.broadcast %146 : vector<16x1xf32> to vector<16x32xf32>
    %148 = arith.subf %138, %147 : vector<16x32xf32>
    %149 = arith.mulf %148, %148 : vector<16x32xf32>
    %cst_76 = arith.constant dense<0.000000e+00> : vector<16xf32>
    %150 = vector.multi_reduction <add>, %149, %cst_76 [1] : vector<16x32xf32> to vector<16xf32>
    %151 = vector.shape_cast %150 : vector<16xf32> to vector<16x1xf32>
    %cst_77 = arith.constant 3.200000e+01 : f32
    %152 = vector.broadcast %cst_77 : f32 to vector<16x1xf32>
    %153 = arith.divf %151, %152 : vector<16x1xf32>
    %154 = vector.broadcast %146 : vector<16x1xf32> to vector<16x32xf32>
    %155 = arith.subf %138, %154 : vector<16x32xf32>
    %cst_78 = arith.constant 9.99999996E-13 : f32
    %156 = vector.broadcast %cst_78 : f32 to vector<16x1xf32>
    %157 = arith.addf %153, %156 : vector<16x1xf32>
    %158 = math.rsqrt %157 : vector<16x1xf32>
    %159 = vector.broadcast %158 : vector<16x1xf32> to vector<16x32xf32>
    %160 = arith.mulf %155, %159 : vector<16x32xf32>
    %161 = vector.broadcast %140 : vector<1x32xf32> to vector<16x32xf32>
    %162 = arith.mulf %160, %161 : vector<16x32xf32>
    %163 = vector.broadcast %142 : vector<1x32xf32> to vector<16x32xf32>
    %164 = arith.addf %162, %163 : vector<16x32xf32>
    %c1 = arith.constant 1 : index
    %c0_79 = arith.constant 0 : index
    %c0_80 = arith.constant 0 : index
    %165 = vector.load %arg6[%c1, %c0_79, %c0_80] : memref<2x32x96xf32, #tpu.memory_space<vmem>>, vector<1x32x96xf32>
    %166 = vector.shape_cast %165 : vector<1x32x96xf32> to vector<32x96xf32>
    %cst_81 = arith.constant dense<0.000000e+00> : vector<16x96xf32>
    %167 = tpu.matmul %164, %166, %cst_81 {dimension_numbers = #tpu.dot_dimension_numbers<[1], [0], [0], [1], [0, 0, 1, 1], [], []>} : vector<16x32xf32>, vector<32x96xf32>, vector<16x96xf32> -> vector<16x96xf32>
    %c1_82 = arith.constant 1 : index
    %c0_83 = arith.constant 0 : index
    %c0_84 = arith.constant 0 : index
    %168 = vector.load %arg7[%c1_82, %c0_83, %c0_84] : memref<2x1x96xf32, #tpu.memory_space<vmem>>, vector<1x1x96xf32>
    %169 = vector.shape_cast %168 : vector<1x1x96xf32> to vector<1x96xf32>
    %170 = vector.broadcast %169 : vector<1x96xf32> to vector<16x96xf32>
    %171 = arith.addf %167, %170 : vector<16x96xf32>
    %172 = vector.extract_strided_slice %171 {offsets = [0, 0], sizes = [16, 32], strides = [1, 1]} : vector<16x96xf32> to vector<16x32xf32>
    %173 = vector.shape_cast %172 : vector<16x32xf32> to vector<2x8x32xf32>
    %174 = vector.extract_strided_slice %171 {offsets = [0, 32], sizes = [16, 32], strides = [1, 1]} : vector<16x96xf32> to vector<16x32xf32>
    %175 = vector.shape_cast %174 : vector<16x32xf32> to vector<2x8x32xf32>
    %176 = vector.extract_strided_slice %171 {offsets = [0, 64], sizes = [16, 32], strides = [1, 1]} : vector<16x96xf32> to vector<16x32xf32>
    %177 = vector.shape_cast %176 : vector<16x32xf32> to vector<2x8x32xf32>
    %178 = vector.extract_strided_slice %173 {offsets = [0, 0, 0], sizes = [2, 8, 16], strides = [1, 1, 1]} : vector<2x8x32xf32> to vector<2x8x16xf32>
    %179 = vector.extract_strided_slice %175 {offsets = [0, 0, 0], sizes = [2, 8, 16], strides = [1, 1, 1]} : vector<2x8x32xf32> to vector<2x8x16xf32>
    "tpu.trace_start"() <{level = 10 : i32, message = "bqd,bkd->bqk"}> : () -> ()
    %cst_85 = arith.constant dense<0.000000e+00> : vector<2x8x8xf32>
    %180 = tpu.matmul %178, %179, %cst_85 {dimension_numbers = #tpu.dot_dimension_numbers<[2], [2], [1], [1], [0, 0, 0, 1, 1, 1], [0], [0]>} : vector<2x8x16xf32>, vector<2x8x16xf32>, vector<2x8x8xf32> -> vector<2x8x8xf32>
    "tpu.trace_stop"() : () -> ()
    %cst_86 = arith.constant 2.500000e-01 : f32
    %181 = vector.broadcast %cst_86 : f32 to vector<2x8x8xf32>
    %182 = arith.mulf %180, %181 : vector<2x8x8xf32>
    %183 = vector.broadcast %30 : vector<2x1x8xf32> to vector<2x8x8xf32>
    %184 = arith.addf %182, %183 : vector<2x8x8xf32>
    %cst_87 = arith.constant dense<0xFF800000> : vector<2x8xf32>
    %185 = vector.multi_reduction <maximumf>, %184, %cst_87 [2] : vector<2x8x8xf32> to vector<2x8xf32>
    %186 = vector.shape_cast %185 : vector<2x8xf32> to vector<2x8x1xf32>
    %187 = vector.broadcast %186 : vector<2x8x1xf32> to vector<2x8x8xf32>
    %188 = arith.subf %184, %187 : vector<2x8x8xf32>
    %189 = math.exp %188 : vector<2x8x8xf32>
    %cst_88 = arith.constant dense<0.000000e+00> : vector<2x8xf32>
    %190 = vector.multi_reduction <add>, %189, %cst_88 [2] : vector<2x8x8xf32> to vector<2x8xf32>
    %191 = vector.shape_cast %190 : vector<2x8xf32> to vector<2x8x1xf32>
    %192 = vector.broadcast %191 : vector<2x8x1xf32> to vector<2x8x8xf32>
    %193 = arith.divf %189, %192 : vector<2x8x8xf32>
    %194 = vector.extract_strided_slice %177 {offsets = [0, 0, 0], sizes = [2, 8, 16], strides = [1, 1, 1]} : vector<2x8x32xf32> to vector<2x8x16xf32>
    "tpu.trace_start"() <{level = 10 : i32, message = "bqk,bkd->bqd"}> : () -> ()
    %cst_89 = arith.constant dense<0.000000e+00> : vector<2x8x16xf32>
    %195 = tpu.matmul %193, %194, %cst_89 {dimension_numbers = #tpu.dot_dimension_numbers<[2], [1], [1], [2], [0, 0, 0, 1, 1, 2], [0], [0]>} : vector<2x8x8xf32>, vector<2x8x16xf32>, vector<2x8x16xf32> -> vector<2x8x16xf32>
    "tpu.trace_stop"() : () -> ()
    %196 = vector.extract_strided_slice %173 {offsets = [0, 0, 16], sizes = [2, 8, 16], strides = [1, 1, 1]} : vector<2x8x32xf32> to vector<2x8x16xf32>
    %197 = vector.extract_strided_slice %175 {offsets = [0, 0, 16], sizes = [2, 8, 16], strides = [1, 1, 1]} : vector<2x8x32xf32> to vector<2x8x16xf32>
    "tpu.trace_start"() <{level = 10 : i32, message = "bqd,bkd->bqk"}> : () -> ()
    %cst_90 = arith.constant dense<0.000000e+00> : vector<2x8x8xf32>
    %198 = tpu.matmul %196, %197, %cst_90 {dimension_numbers = #tpu.dot_dimension_numbers<[2], [2], [1], [1], [0, 0, 0, 1, 1, 1], [0], [0]>} : vector<2x8x16xf32>, vector<2x8x16xf32>, vector<2x8x8xf32> -> vector<2x8x8xf32>
    "tpu.trace_stop"() : () -> ()
    %cst_91 = arith.constant 2.500000e-01 : f32
    %199 = vector.broadcast %cst_91 : f32 to vector<2x8x8xf32>
    %200 = arith.mulf %198, %199 : vector<2x8x8xf32>
    %201 = vector.broadcast %30 : vector<2x1x8xf32> to vector<2x8x8xf32>
    %202 = arith.addf %200, %201 : vector<2x8x8xf32>
    %cst_92 = arith.constant dense<0xFF800000> : vector<2x8xf32>
    %203 = vector.multi_reduction <maximumf>, %202, %cst_92 [2] : vector<2x8x8xf32> to vector<2x8xf32>
    %204 = vector.shape_cast %203 : vector<2x8xf32> to vector<2x8x1xf32>
    %205 = vector.broadcast %204 : vector<2x8x1xf32> to vector<2x8x8xf32>
    %206 = arith.subf %202, %205 : vector<2x8x8xf32>
    %207 = math.exp %206 : vector<2x8x8xf32>
    %cst_93 = arith.constant dense<0.000000e+00> : vector<2x8xf32>
    %208 = vector.multi_reduction <add>, %207, %cst_93 [2] : vector<2x8x8xf32> to vector<2x8xf32>
    %209 = vector.shape_cast %208 : vector<2x8xf32> to vector<2x8x1xf32>
    %210 = vector.broadcast %209 : vector<2x8x1xf32> to vector<2x8x8xf32>
    %211 = arith.divf %207, %210 : vector<2x8x8xf32>
    %212 = vector.extract_strided_slice %177 {offsets = [0, 0, 16], sizes = [2, 8, 16], strides = [1, 1, 1]} : vector<2x8x32xf32> to vector<2x8x16xf32>
    "tpu.trace_start"() <{level = 10 : i32, message = "bqk,bkd->bqd"}> : () -> ()
    %cst_94 = arith.constant dense<0.000000e+00> : vector<2x8x16xf32>
    %213 = tpu.matmul %211, %212, %cst_94 {dimension_numbers = #tpu.dot_dimension_numbers<[2], [1], [1], [2], [0, 0, 0, 1, 1, 2], [0], [0]>} : vector<2x8x8xf32>, vector<2x8x16xf32>, vector<2x8x16xf32> -> vector<2x8x16xf32>
    "tpu.trace_stop"() : () -> ()
    %214 = tpu.concatenate %195, %213 in 2 : vector<2x8x16xf32>, vector<2x8x16xf32> -> vector<2x8x32xf32>
    %215 = vector.shape_cast %214 : vector<2x8x32xf32> to vector<16x32xf32>
    %c1_95 = arith.constant 1 : index
    %c0_96 = arith.constant 0 : index
    %c0_97 = arith.constant 0 : index
    %216 = vector.load %arg8[%c1_95, %c0_96, %c0_97] : memref<2x32x32xf32, #tpu.memory_space<vmem>>, vector<1x32x32xf32>
    %217 = vector.shape_cast %216 : vector<1x32x32xf32> to vector<32x32xf32>
    %cst_98 = arith.constant dense<0.000000e+00> : vector<16x32xf32>
    %218 = tpu.matmul %215, %217, %cst_98 {dimension_numbers = #tpu.dot_dimension_numbers<[1], [0], [0], [1], [0, 0, 1, 1], [], []>} : vector<16x32xf32>, vector<32x32xf32>, vector<16x32xf32> -> vector<16x32xf32>
    %c1_99 = arith.constant 1 : index
    %c0_100 = arith.constant 0 : index
    %c0_101 = arith.constant 0 : index
    %219 = vector.load %arg9[%c1_99, %c0_100, %c0_101] : memref<2x1x32xf32, #tpu.memory_space<vmem>>, vector<1x1x32xf32>
    %220 = vector.shape_cast %219 : vector<1x1x32xf32> to vector<1x32xf32>
    %221 = vector.broadcast %220 : vector<1x32xf32> to vector<16x32xf32>
    %222 = arith.addf %218, %221 : vector<16x32xf32>
    %223 = arith.addf %164, %222 : vector<16x32xf32>
    %c1_102 = arith.constant 1 : index
    %c0_103 = arith.constant 0 : index
    %c0_104 = arith.constant 0 : index
    %224 = vector.load %arg10[%c1_102, %c0_103, %c0_104] : memref<2x1x32xf32, #tpu.memory_space<vmem>>, vector<1x1x32xf32>
    %225 = vector.shape_cast %224 : vector<1x1x32xf32> to vector<1x32xf32>
    %c1_105 = arith.constant 1 : index
    %c0_106 = arith.constant 0 : index
    %c0_107 = arith.constant 0 : index
    %226 = vector.load %arg11[%c1_105, %c0_106, %c0_107] : memref<2x1x32xf32, #tpu.memory_space<vmem>>, vector<1x1x32xf32>
    %227 = vector.shape_cast %226 : vector<1x1x32xf32> to vector<1x32xf32>
    %cst_108 = arith.constant dense<0.000000e+00> : vector<16xf32>
    %228 = vector.multi_reduction <add>, %223, %cst_108 [1] : vector<16x32xf32> to vector<16xf32>
    %229 = vector.shape_cast %228 : vector<16xf32> to vector<16x1xf32>
    %cst_109 = arith.constant 3.200000e+01 : f32
    %230 = vector.broadcast %cst_109 : f32 to vector<16x1xf32>
    %231 = arith.divf %229, %230 : vector<16x1xf32>
    %232 = vector.broadcast %231 : vector<16x1xf32> to vector<16x32xf32>
    %233 = arith.subf %223, %232 : vector<16x32xf32>
    %234 = arith.mulf %233, %233 : vector<16x32xf32>
    %cst_110 = arith.constant dense<0.000000e+00> : vector<16xf32>
    %235 = vector.multi_reduction <add>, %234, %cst_110 [1] : vector<16x32xf32> to vector<16xf32>
    %236 = vector.shape_cast %235 : vector<16xf32> to vector<16x1xf32>
    %cst_111 = arith.constant 3.200000e+01 : f32
    %237 = vector.broadcast %cst_111 : f32 to vector<16x1xf32>
    %238 = arith.divf %236, %237 : vector<16x1xf32>
    %239 = vector.broadcast %231 : vector<16x1xf32> to vector<16x32xf32>
    %240 = arith.subf %223, %239 : vector<16x32xf32>
    %cst_112 = arith.constant 9.99999996E-13 : f32
    %241 = vector.broadcast %cst_112 : f32 to vector<16x1xf32>
    %242 = arith.addf %238, %241 : vector<16x1xf32>
    %243 = math.rsqrt %242 : vector<16x1xf32>
    %244 = vector.broadcast %243 : vector<16x1xf32> to vector<16x32xf32>
    %245 = arith.mulf %240, %244 : vector<16x32xf32>
    %246 = vector.broadcast %225 : vector<1x32xf32> to vector<16x32xf32>
    %247 = arith.mulf %245, %246 : vector<16x32xf32>
    %248 = vector.broadcast %227 : vector<1x32xf32> to vector<16x32xf32>
    %249 = arith.addf %247, %248 : vector<16x32xf32>
    %c1_113 = arith.constant 1 : index
    %c0_114 = arith.constant 0 : index
    %c0_115 = arith.constant 0 : index
    %250 = vector.load %arg12[%c1_113, %c0_114, %c0_115] : memref<2x32x64xf32, #tpu.memory_space<vmem>>, vector<1x32x64xf32>
    %251 = vector.shape_cast %250 : vector<1x32x64xf32> to vector<32x64xf32>
    %cst_116 = arith.constant dense<0.000000e+00> : vector<16x64xf32>
    %252 = tpu.matmul %249, %251, %cst_116 {dimension_numbers = #tpu.dot_dimension_numbers<[1], [0], [0], [1], [0, 0, 1, 1], [], []>} : vector<16x32xf32>, vector<32x64xf32>, vector<16x64xf32> -> vector<16x64xf32>
    %c1_117 = arith.constant 1 : index
    %c0_118 = arith.constant 0 : index
    %c0_119 = arith.constant 0 : index
    %253 = vector.load %arg13[%c1_117, %c0_118, %c0_119] : memref<2x1x64xf32, #tpu.memory_space<vmem>>, vector<1x1x64xf32>
    %254 = vector.shape_cast %253 : vector<1x1x64xf32> to vector<1x64xf32>
    %255 = vector.broadcast %254 : vector<1x64xf32> to vector<16x64xf32>
    %256 = arith.addf %252, %255 : vector<16x64xf32>
    %cst_120 = arith.constant 5.000000e-01 : f32
    %257 = vector.broadcast %cst_120 : f32 to vector<16x64xf32>
    %258 = arith.mulf %257, %256 : vector<16x64xf32>
    %cst_121 = arith.constant 0.707106769 : f32
    %259 = vector.broadcast %cst_121 : f32 to vector<16x64xf32>
    %260 = arith.mulf %256, %259 : vector<16x64xf32>
    %261 = math.erf %260 : vector<16x64xf32>
    %cst_122 = arith.constant 1.000000e+00 : f32
    %262 = vector.broadcast %cst_122 : f32 to vector<16x64xf32>
    %263 = arith.addf %262, %261 : vector<16x64xf32>
    %264 = arith.mulf %258, %263 : vector<16x64xf32>
    %c1_123 = arith.constant 1 : index
    %c0_124 = arith.constant 0 : index
    %c0_125 = arith.constant 0 : index
    %265 = vector.load %arg14[%c1_123, %c0_124, %c0_125] : memref<2x64x32xf32, #tpu.memory_space<vmem>>, vector<1x64x32xf32>
    %266 = vector.shape_cast %265 : vector<1x64x32xf32> to vector<64x32xf32>
    %cst_126 = arith.constant dense<0.000000e+00> : vector<16x32xf32>
    %267 = tpu.matmul %264, %266, %cst_126 {dimension_numbers = #tpu.dot_dimension_numbers<[1], [0], [0], [1], [0, 0, 1, 1], [], []>} : vector<16x64xf32>, vector<64x32xf32>, vector<16x32xf32> -> vector<16x32xf32>
    %c1_127 = arith.constant 1 : index
    %c0_128 = arith.constant 0 : index
    %c0_129 = arith.constant 0 : index
    %268 = vector.load %arg15[%c1_127, %c0_128, %c0_129] : memref<2x1x32xf32, #tpu.memory_space<vmem>>, vector<1x1x32xf32>
    %269 = vector.shape_cast %268 : vector<1x1x32xf32> to vector<1x32xf32>
    %270 = vector.broadcast %269 : vector<1x32xf32> to vector<16x32xf32>
    %271 = arith.addf %267, %270 : vector<16x32xf32>
    %272 = arith.addf %249, %271 : vector<16x32xf32>
    %c1_130 = arith.constant 1 : index
    %c0_131 = arith.constant 0 : index
    %c0_132 = arith.constant 0 : index
    %273 = vector.load %arg16[%c1_130, %c0_131, %c0_132] : memref<2x1x32xf32, #tpu.memory_space<vmem>>, vector<1x1x32xf32>
    %274 = vector.shape_cast %273 : vector<1x1x32xf32> to vector<1x32xf32>
    %c1_133 = arith.constant 1 : index
    %c0_134 = arith.constant 0 : index
    %c0_135 = arith.constant 0 : index
    %275 = vector.load %arg17[%c1_133, %c0_134, %c0_135] : memref<2x1x32xf32, #tpu.memory_space<vmem>>, vector<1x1x32xf32>
    %276 = vector.shape_cast %275 : vector<1x1x32xf32> to vector<1x32xf32>
    %cst_136 = arith.constant dense<0.000000e+00> : vector<16xf32>
    %277 = vector.multi_reduction <add>, %272, %cst_136 [1] : vector<16x32xf32> to vector<16xf32>
    %278 = vector.shape_cast %277 : vector<16xf32> to vector<16x1xf32>
    %cst_137 = arith.constant 3.200000e+01 : f32
    %279 = vector.broadcast %cst_137 : f32 to vector<16x1xf32>
    %280 = arith.divf %278, %279 : vector<16x1xf32>
    %281 = vector.broadcast %280 : vector<16x1xf32> to vector<16x32xf32>
    %282 = arith.subf %272, %281 : vector<16x32xf32>
    %283 = arith.mulf %282, %282 : vector<16x32xf32>
    %cst_138 = arith.constant dense<0.000000e+00> : vector<16xf32>
    %284 = vector.multi_reduction <add>, %283, %cst_138 [1] : vector<16x32xf32> to vector<16xf32>
    %285 = vector.shape_cast %284 : vector<16xf32> to vector<16x1xf32>
    %cst_139 = arith.constant 3.200000e+01 : f32
    %286 = vector.broadcast %cst_139 : f32 to vector<16x1xf32>
    %287 = arith.divf %285, %286 : vector<16x1xf32>
    %288 = vector.broadcast %280 : vector<16x1xf32> to vector<16x32xf32>
    %289 = arith.subf %272, %288 : vector<16x32xf32>
    %cst_140 = arith.constant 9.99999996E-13 : f32
    %290 = vector.broadcast %cst_140 : f32 to vector<16x1xf32>
    %291 = arith.addf %287, %290 : vector<16x1xf32>
    %292 = math.rsqrt %291 : vector<16x1xf32>
    %293 = vector.broadcast %292 : vector<16x1xf32> to vector<16x32xf32>
    %294 = arith.mulf %289, %293 : vector<16x32xf32>
    %295 = vector.broadcast %274 : vector<1x32xf32> to vector<16x32xf32>
    %296 = arith.mulf %294, %295 : vector<16x32xf32>
    %297 = vector.broadcast %276 : vector<1x32xf32> to vector<16x32xf32>
    %298 = arith.addf %296, %297 : vector<16x32xf32>
    %299 = vector.extract_strided_slice %298 {offsets = [0, 0], sizes = [1, 32], strides = [1, 1]} : vector<16x32xf32> to vector<1x32xf32>
    %300 = vector.extract_strided_slice %298 {offsets = [8, 0], sizes = [1, 32], strides = [1, 1]} : vector<16x32xf32> to vector<1x32xf32>
    %301 = tpu.concatenate %299, %300 in 0 : vector<1x32xf32>, vector<1x32xf32> -> vector<2x32xf32>
    %c0_141 = arith.constant 0 : index
    %c0_142 = arith.constant 0 : index
    %302 = vector.load %arg18[%c0_141, %c0_142] : memref<32x32xf32, #tpu.memory_space<vmem>>, vector<32x32xf32>
    %cst_143 = arith.constant dense<0.000000e+00> : vector<2x32xf32>
    %303 = tpu.matmul %301, %302, %cst_143 {dimension_numbers = #tpu.dot_dimension_numbers<[1], [0], [0], [1], [0, 0, 1, 1], [], []>} : vector<2x32xf32>, vector<32x32xf32>, vector<2x32xf32> -> vector<2x32xf32>
    %c0_144 = arith.constant 0 : index
    %c0_145 = arith.constant 0 : index
    %304 = vector.load %arg19[%c0_144, %c0_145] : memref<1x32xf32, #tpu.memory_space<vmem>>, vector<1x32xf32>
    %305 = vector.broadcast %304 : vector<1x32xf32> to vector<2x32xf32>
    %306 = arith.addf %303, %305 : vector<2x32xf32>
    %307 = math.tanh %306 : vector<2x32xf32>
    %c0_146 = arith.constant 0 : index
    %c0_147 = arith.constant 0 : index
    %308 = vector.load %arg20[%c0_146, %c0_147] : memref<32x128xf32, #tpu.memory_space<vmem>>, vector<32x128xf32>
    %cst_148 = arith.constant dense<0.000000e+00> : vector<2x128xf32>
    %309 = tpu.matmul %307, %308, %cst_148 {dimension_numbers = #tpu.dot_dimension_numbers<[1], [0], [0], [1], [0, 0, 1, 1], [], []>} : vector<2x32xf32>, vector<32x128xf32>, vector<2x128xf32> -> vector<2x128xf32>
    %c0_149 = arith.constant 0 : index
    %c0_150 = arith.constant 0 : index
    %310 = vector.load %arg21[%c0_149, %c0_150] : memref<1x128xf32, #tpu.memory_space<vmem>>, vector<1x128xf32>
    %311 = vector.broadcast %310 : vector<1x128xf32> to vector<2x128xf32>
    %312 = arith.addf %309, %311 : vector<2x128xf32>
    %c0_151 = arith.constant 0 : index
    %c0_152 = arith.constant 0 : index
    %313 = vector.load %arg22[%c0_151, %c0_152] : memref<2x128xf32, #tpu.memory_space<vmem>>, vector<2x128xf32>
    tpu.vector_store %arg22[%c0_151, %c0_152], %312 {strides = array<i32>} : memref<2x128xf32, #tpu.memory_space<vmem>>, vector<2x128xf32>,
    return
  }
}

</mosaic_0001>

<bundles_post_ra>
// kernel: tpu_custom_call.1
= control target key start
LH: loop header
LB: loop body
LE: loop exit
PB: predicated region body
PF: predicated region fallthrough
CT: control target
= control target key end

     0   :  { %s4531_s0 = inlined_call_operand.hbm [shape: f32[16,32], index: 0, kind: input, shape index: {}]   ;;  %s4532_s1 = inlined_call_operand.hbm [shape: f32[16,32], index: 1, kind: input, shape index: {}]   ;;  %s4533_s2 = inlined_call_operand.hbm [shape: f32[8,32], index: 2, kind: input, shape index: {}]   ;;  %s4534_s3 = inlined_call_operand.hbm [shape: f32[2,1,8], index: 3, kind: input, shape index: {}]   ;;  %s4535_s4 = inlined_call_operand.hbm [shape: f32[1,32], index: 4, kind: input, shape index: {}]   ;;  %s4536_s5 = inlined_call_operand.hbm [shape: f32[1,32], index: 5, kind: input, shape index: {}]   ;;  %s4537_s6 = inlined_call_operand.vmem [shape: f32[2,32,96], index: 6, kind: input, shape index: {}]   ;;  %s4538_s7 = inlined_call_operand.hbm [shape: f32[2,1,96], index: 7, kind: input, shape index: {}]   ;;  %s4539_s8 = inlined_call_operand.vmem [shape: f32[2,32,32], index: 8, kind: input, shape index: {}]   ;;  %s4540_s9 = inlined_call_operand.hbm [shape: f32[2,1,32], index: 9, kind: input, shape index: {}]   ;;  %s4541_s10 = inlined_call_operand.hbm [shape: f32[2,1,32], index: 10, kind: input, shape index: {}]   ;;  %s4542_s11 = inlined_call_operand.hbm [shape: f32[2,1,32], index: 11, kind: input, shape index: {}]   ;;  %s4543_s12 = inlined_call_operand.vmem [shape: f32[2,32,64], index: 12, kind: input, shape index: {}]   ;;  %s4544_s13 = inlined_call_operand.hbm [shape: f32[2,1,64], index: 13, kind: input, shape index: {}]   ;;  %s4545_s14 = inlined_call_operand.vmem [shape: f32[2,64,32], index: 14, kind: input, shape index: {}]   ;;  %s4546_s15 = inlined_call_operand.hbm [shape: f32[2,1,32], index: 15, kind: input, shape index: {}]   ;;  %s4547_s16 = inlined_call_operand.hbm [shape: f32[2,1,32], index: 16, kind: input, shape index: {}]   ;;  %s4548_s17 = inlined_call_operand.hbm [shape: f32[2,1,32], index: 17, kind: input, shape index: {}]   ;;  %s4549_s18 = inlined_call_operand.vmem [shape: f32[32,32], index: 18, kind: input, shape index: {}]   ;;  %s4550_s19 = inlined_call_operand.vmem [shape: f32[1,32], index: 19, kind: input, shape index: {}]   ;;  %s4551_s20 = inlined_call_operand.vmem [shape: f32[32,128], index: 20, kind: input, shape index: {}]   ;;  %s4552_s21 = inlined_call_operand.vmem [shape: f32[1,128], index: 21, kind: input, shape index: {}]   ;;  %s4553_s22 = inlined_call_operand.hbm [shape: f32[2,128], index: 22, kind: output, shape index: {}]  }
   0x1   :  { %4564 = sst [smem:[#allocation35_spill]] %s4531_s0 }
   0x2   :  { %4565 = sst [smem:[#allocation36_spill]] %s4532_s1 }
   0x3   :  { %4566 = sst [smem:[#allocation37_spill]] %s4533_s2 }
   0x4   :  { %4567 = sst [smem:[#allocation38_spill]] %s4534_s3 }
   0x5   :  { %4568 = sst [smem:[#allocation39_spill]] %s4535_s4 }
   0x6   :  { %4569 = sst [smem:[#allocation40_spill]] %s4536_s5 }
   0x7   :  { %4570 = sst [smem:[#allocation41_spill]] %s4537_s6 }
   0x8   :  { %4571 = sst [smem:[#allocation42_spill]] %s4550_s19 }
   0x9   :  { %4572 = sst [smem:[#allocation43_spill]] %s4552_s21 }
   0xa   :  { %4573 = sst [smem:[#allocation44_spill]] %s4553_s22 }
   0xb   :  { %27 = vsyncpa [#allocation3], 0 }
   0xc   :  { %28 = vsyncpa [#allocation6], 0 }
   0xd   :  { %29 = vsyncpa [#allocation9], 0 }
   0xe   :  { %30 = vsyncpa [#allocation12], 0 }
   0xf   :  { %31 = vsyncpa [#allocation15], 0 }
  0x10   :  { %32 = vsyncpa [#allocation18], 0 }
  0x11   :  { %33 = vsyncpa [#allocation21], 0 }
  0x12   :  { %34 = vsyncpa [#allocation24], 0 }
  0x13   :  { %35 = vsyncpa [#allocation4], 0  ;;  %s3754_s3 = smov [#allocation5]   ;;  %s3755_s29 = smov [#allocation8]  }
  0x14   :  { %s53_s28 = sshll.u32 %s3754_s3, 4  ;;  %s75_s30 = sshll.u32 %s3755_s29, 4  ;;  %s54_s28 = int_to_ptr.vmem [resolvable:$true] %s53_s28  ;;  %s3896_s30 = int_to_ptr.vmem [resolvable:$true] %s75_s30 }
  0x15   :  { %s4574_s23 = sld [smem:[#allocation36_spill]] }
  0x1b   :  { %s3406_s1 = scalar_lea.hbm %s4574_s23, 256 }
  0x1c   :  { %p3407_p0 = scmp.ne.s32.totalorder %s4574_s23, %s3406_s1  ;;  %p3410_p1 = scmp.lt.u32.totalorder %s3406_s1, %s4574_s23 }
  0x1e   :  { %p3412_p2 = pnand %p3410_p1, %p3407_p0 }
  0x20   :  { %3415 = shalt.err (!%p3412_p2)
}
  0x21   :  { %s3416_s26 = scalar_lea.vmem %s54_s28, 256  ;;  %p3421_p4 = scmp.lt.s32.totalorder %s54_s28, %s54_s28 }
  0x22   :  { %p3417_p3 = scmp.ne.s32.totalorder %s54_s28, %s3416_s26  ;;  %p3422_p5 = scmp.lt.s32.totalorder %s3416_s26, %s3416_s26 }
  0x24   :  { %p3423_p6 = por %p3422_p5, %p3421_p4 }
  0x26   :  { %p3424_p7 = pnand %p3423_p6, %p3417_p3 }
  0x28   :  { %3427 = shalt.err (!%p3424_p7)
}
  0x29   :  { %s4562_s2 = smov 128   ;;  %s4563_s27 = smov 8  }
  0x2a   :  { %59 = dma.hbm_to_vmem [thread:$0]  %s4574_s23, 256, %s54_s28, [#allocation6], %s4562_s2, %s4562_s2, %s4563_s27  }
  0x2b   :  { %s4575_s1 = sld [smem:[#allocation38_spill]] }
  0x31   :  { %s3428_s5 = scalar_lea.hbm %s4575_s1, 32 }
  0x32   :  { %p3429_p8 = scmp.ne.s32.totalorder %s4575_s1, %s3428_s5  ;;  %p3432_p9 = scmp.lt.u32.totalorder %s3428_s5, %s4575_s1 }
  0x34   :  { %p3434_p10 = pnand %p3432_p9, %p3429_p8 }
  0x36   :  { %3437 = shalt.err (!%p3434_p10)
}
  0x37   :  { %s3438_s22 = scalar_lea.vmem %s3896_s30, 32  ;;  %p3443_p12 = scmp.lt.s32.totalorder %s3896_s30, %s3896_s30 }
  0x38   :  { %p3439_p11 = scmp.ne.s32.totalorder %s3896_s30, %s3438_s22  ;;  %p3444_p13 = scmp.lt.s32.totalorder %s3438_s22, %s3438_s22 }
  0x3a   :  { %p3445_p0 = por %p3444_p13, %p3443_p12 }
  0x3c   :  { %p3446_p1 = pnand %p3445_p0, %p3439_p11 }
  0x3e   :  { %3449 = shalt.err (!%p3446_p1)
}
  0x3f   :  { %s3758_s28 = smov 16   ;;  %s3759_s23 = smov 1  }
  0x40   :  { %81 = dma.hbm_to_vmem [thread:$0]  %s4575_s1, 32, %s3896_s30, [#allocation9], %s3758_s28, %s3758_s28, %s3759_s23  }
  0x41   :  { %s3760_s4 = smov [#allocation11]   ;;  %s3761_s5 = smov [#allocation14]  }
  0x42   :  { %s98_s0 = sshll.u32 %s3760_s4, 4  ;;  %s123_s24 = sshll.u32 %s3761_s5, 4  ;;  %s99_s0 = int_to_ptr.vmem [resolvable:$true] %s98_s0  ;;  %s3933_s24 = int_to_ptr.vmem [resolvable:$true] %s123_s24 }
  0x43   :  { %s4576_s25 = sld [smem:[#allocation40_spill]] }
  0x49   :  { %s3450_s26 = scalar_lea.hbm %s4576_s25, 16 }
  0x4a   :  { %p3451_p2 = scmp.ne.s32.totalorder %s4576_s25, %s3450_s26  ;;  %p3454_p3 = scmp.lt.u32.totalorder %s3450_s26, %s4576_s25 }
  0x4c   :  { %p3456_p4 = pnand %p3454_p3, %p3451_p2 }
  0x4e   :  { %3459 = shalt.err (!%p3456_p4)
}
  0x4f   :  { %s3460_s30 = scalar_lea.vmem %s99_s0, 16  ;;  %s3464_s1 = scalar_lea.vmem %s99_s0, 32 }
  0x50   :  { %p3461_p5 = scmp.ne.s32.totalorder %s99_s0, %s3460_s30  ;;  %p3465_p6 = scmp.lt.s32.totalorder %s99_s0, %s99_s0 }
  0x51   :  { %p3466_p7 = scmp.lt.s32.totalorder %s3464_s1, %s3460_s30 }
  0x53   :  { %p3467_p8 = por %p3466_p7, %p3465_p6 }
  0x55   :  { %p3468_p9 = pnand %p3467_p8, %p3461_p5 }
  0x57   :  { %3471 = shalt.err (!%p3468_p9)
}
  0x58   :  { %101 = dma.hbm_to_vmem [thread:$0]  %s4576_s25, 16, %s99_s0, [#allocation12]  }
  0x59   :  { %s3472_s4 = scalar_lea.hbm %s4540_s9, 32 }
  0x5a   :  { %p3473_p10 = scmp.ne.s32.totalorder %s4540_s9, %s3472_s4  ;;  %p3476_p11 = scmp.lt.u32.totalorder %s3472_s4, %s4540_s9 }
  0x5c   :  { %p3478_p12 = pnand %p3476_p11, %p3473_p10 }
  0x5e   :  { %3481 = shalt.err (!%p3478_p12)
}
  0x5f   :  { %s3482_s6 = scalar_lea.vmem %s3933_s24, 32  ;;  %p3487_p0 = scmp.lt.s32.totalorder %s3933_s24, %s3933_s24 }
  0x60   :  { %p3483_p13 = scmp.ne.s32.totalorder %s3933_s24, %s3482_s6  ;;  %p3488_p1 = scmp.lt.s32.totalorder %s3482_s6, %s3482_s6 }
  0x62   :  { %p3489_p2 = por %p3488_p1, %p3487_p0 }
  0x64   :  { %p3490_p3 = pnand %p3489_p2, %p3483_p13 }
  0x66   :  { %3493 = shalt.err (!%p3490_p3)
}
  0x67   :  { %129 = dma.hbm_to_vmem [thread:$0]  %s4540_s9, 32, %s3933_s24, [#allocation15], %s3758_s28, %s3758_s28, %s3759_s23  }
  0x68   :  { %s3762_s26 = smov [#allocation17]   ;;  %s3763_s1 = smov [#allocation20]  }
  0x69   :  { %s147_s30 = sshll.u32 %s3762_s26, 4  ;;  %s175_s3 = sshll.u32 %s3763_s1, 4  ;;  %s148_s30 = int_to_ptr.vmem [resolvable:$true] %s147_s30  ;;  %s3967_s3 = int_to_ptr.vmem [resolvable:$true] %s175_s3 }
  0x6a   :  { %s3494_s27 = scalar_lea.hbm %s4542_s11, 32 }
  0x6b   :  { %p3495_p4 = scmp.ne.s32.totalorder %s4542_s11, %s3494_s27  ;;  %p3498_p5 = scmp.lt.u32.totalorder %s3494_s27, %s4542_s11 }
  0x6d   :  { %p3500_p6 = pnand %p3498_p5, %p3495_p4 }
  0x6f   :  { %3503 = shalt.err (!%p3500_p6)
}
  0x70   :  { %s3504_s9 = scalar_lea.vmem %s148_s30, 32  ;;  %p3509_p8 = scmp.lt.s32.totalorder %s148_s30, %s148_s30 }
  0x71   :  { %p3505_p7 = scmp.ne.s32.totalorder %s148_s30, %s3504_s9  ;;  %p3510_p9 = scmp.lt.s32.totalorder %s3504_s9, %s3504_s9 }
  0x73   :  { %p3511_p10 = por %p3510_p9, %p3509_p8 }
  0x75   :  { %p3512_p11 = pnand %p3511_p10, %p3505_p7 }
  0x77   :  { %3515 = shalt.err (!%p3512_p11)
}
  0x78   :  { %153 = dma.hbm_to_vmem [thread:$0]  %s4542_s11, 32, %s148_s30, [#allocation18], %s3758_s28, %s3758_s28, %s3759_s23  }
  0x79   :  { %s3516_s25 = scalar_lea.hbm %s4546_s15, 32 }
  0x7a   :  { %p3517_p12 = scmp.ne.s32.totalorder %s4546_s15, %s3516_s25  ;;  %p3520_p13 = scmp.lt.u32.totalorder %s3516_s25, %s4546_s15 }
  0x7c   :  { %p3522_p0 = pnand %p3520_p13, %p3517_p12 }
  0x7e   :  { %3525 = shalt.err (!%p3522_p0)
}
  0x7f   :  { %s3526_s27 = scalar_lea.vmem %s3967_s3, 32  ;;  %p3531_p2 = scmp.lt.s32.totalorder %s3967_s3, %s3967_s3 }
  0x80   :  { %p3527_p1 = scmp.ne.s32.totalorder %s3967_s3, %s3526_s27  ;;  %p3532_p3 = scmp.lt.s32.totalorder %s3526_s27, %s3526_s27 }
  0x82   :  { %p3533_p4 = por %p3532_p3, %p3531_p2 }
  0x84   :  { %p3534_p5 = pnand %p3533_p4, %p3527_p1 }
  0x86   :  { %3537 = shalt.err (!%p3534_p5)
}
  0x87   :  { %181 = dma.hbm_to_vmem [thread:$0]  %s4546_s15, 32, %s3967_s3, [#allocation21], %s3758_s28, %s3758_s28, %s3759_s23  }
  0x88   :  { %s3764_s4 = smov [#allocation2]   ;;  %s3765_s21 = smov [#allocation7]  }
  0x89   :  { %s41_s19 = sshll.u32 %s3764_s4, 4  ;;  %s66_s5 = sshll.u32 %s3765_s21, 4  ;;  %s42_s19 = int_to_ptr.vmem [resolvable:$true] %s41_s19  ;;  %s67_s5 = int_to_ptr.vmem [resolvable:$true] %s66_s5 }
  0x8a   :  { %s4577_s22 = sld [smem:[#allocation35_spill]] }
  0x90   :  { %s3538_s6 = scalar_lea.hbm %s4577_s22, 256 }
  0x91   :  { %p3539_p6 = scmp.ne.s32.totalorder %s4577_s22, %s3538_s6  ;;  %p3542_p7 = scmp.lt.u32.totalorder %s3538_s6, %s4577_s22 }
  0x93   :  { %p3544_p8 = pnand %p3542_p7, %p3539_p6 }
  0x95   :  { %3547 = shalt.err (!%p3544_p8)
}
  0x96   :  { %s3548_s15 = scalar_lea.vmem %s42_s19, 256  ;;  %p3553_p10 = scmp.lt.s32.totalorder %s42_s19, %s42_s19 }
  0x97   :  { %p3549_p9 = scmp.ne.s32.totalorder %s42_s19, %s3548_s15  ;;  %p3554_p11 = scmp.lt.s32.totalorder %s3548_s15, %s3548_s15 }
  0x99   :  { %p3555_p12 = por %p3554_p11, %p3553_p10 }
  0x9b   :  { %p3556_p13 = pnand %p3555_p12, %p3549_p9 }
  0x9d   :  { %3559 = shalt.err (!%p3556_p13)
}
  0x9e   :  { %s4578_s3 = smov 8   ;;  %s4579_s29 = smov 128  }
  0x9f   :  { %47 = dma.hbm_to_vmem [thread:$0]  %s4577_s22, 256, %s42_s19, [#allocation3], %s4579_s29, %s4579_s29, %s4578_s3  }
  0xa0   :  { %s4580_s4 = sld [smem:[#allocation37_spill]] }
  0xa6   :  { %s3560_s21 = scalar_lea.hbm %s4580_s4, 128 }
  0xa7   :  { %p3561_p0 = scmp.ne.s32.totalorder %s4580_s4, %s3560_s21  ;;  %p3564_p1 = scmp.lt.u32.totalorder %s3560_s21, %s4580_s4 }
  0xa9   :  { %p3566_p2 = pnand %p3564_p1, %p3561_p0 }
  0xab   :  { %3569 = shalt.err (!%p3566_p2)
}
  0xac   :  { %s3570_s25 = scalar_lea.vmem %s67_s5, 128  ;;  %p3575_p4 = scmp.lt.s32.totalorder %s67_s5, %s67_s5 }
  0xad   :  { %p3571_p3 = scmp.ne.s32.totalorder %s67_s5, %s3570_s25  ;;  %p3576_p5 = scmp.lt.s32.totalorder %s3570_s25, %s3570_s25 }
  0xaf   :  { %p3577_p6 = por %p3576_p5, %p3575_p4 }
  0xb1   :  { %p3578_p7 = pnand %p3577_p6, %p3571_p3 }
  0xb3   :  { %3581 = shalt.err (!%p3578_p7)
}
  0xb4   :  { %69 = dma.hbm_to_vmem [thread:$0]  %s4580_s4, 128, %s67_s5, [#allocation6]  }
  0xb5   :  { %s3766_s26 = smov [#allocation10]   ;;  %s3767_s15 = smov [#allocation13]  }
  0xb6   :  { %s88_s1 = sshll.u32 %s3766_s26, 4  ;;  %s109_s3 = sshll.u32 %s3767_s15, 4  ;;  %s89_s1 = int_to_ptr.vmem [resolvable:$true] %s88_s1  ;;  %s4031_s3 = int_to_ptr.vmem [resolvable:$true] %s109_s3 }
  0xb7   :  { %s4581_s27 = sld [smem:[#allocation39_spill]] }
  0xbd   :  { %s3582_s11 = scalar_lea.hbm %s4581_s27, 16 }
  0xbe   :  { %p3583_p8 = scmp.ne.s32.totalorder %s4581_s27, %s3582_s11  ;;  %p3586_p9 = scmp.lt.u32.totalorder %s3582_s11, %s4581_s27 }
  0xc0   :  { %p3588_p10 = pnand %p3586_p9, %p3583_p8 }
  0xc2   :  { %3591 = shalt.err (!%p3588_p10)
}
  0xc3   :  { %s3592_s5 = scalar_lea.vmem %s89_s1, 16  ;;  %s3596_s4 = scalar_lea.vmem %s89_s1, 32 }
  0xc4   :  { %p3593_p11 = scmp.ne.s32.totalorder %s89_s1, %s3592_s5  ;;  %p3597_p12 = scmp.lt.s32.totalorder %s89_s1, %s89_s1 }
  0xc5   :  { %p3598_p13 = scmp.lt.s32.totalorder %s3596_s4, %s3592_s5 }
  0xc7   :  { %p3599_p0 = por %p3598_p13, %p3597_p12 }
  0xc9   :  { %p3600_p1 = pnand %p3599_p0, %p3593_p11 }
  0xcb   :  { %3603 = shalt.err (!%p3600_p1)
}
  0xcc   :  { %91 = dma.hbm_to_vmem [thread:$0]  %s4581_s27, 16, %s89_s1, [#allocation9]  }
  0xcd   :  { %s3604_s22 = scalar_lea.hbm %s4538_s7, 32 }
  0xce   :  { %p3605_p2 = scmp.ne.s32.totalorder %s4538_s7, %s3604_s22  ;;  %p3608_p3 = scmp.lt.u32.totalorder %s3604_s22, %s4538_s7 }
  0xd0   :  { %p3610_p4 = pnand %p3608_p3, %p3605_p2 }
  0xd2   :  { %3613 = shalt.err (!%p3610_p4)
}
  0xd3   :  { %s3614_s11 = scalar_lea.vmem %s4031_s3, 32  ;;  %p3619_p6 = scmp.lt.s32.totalorder %s4031_s3, %s4031_s3 }
  0xd4   :  { %p3615_p5 = scmp.ne.s32.totalorder %s4031_s3, %s3614_s11  ;;  %p3620_p7 = scmp.lt.s32.totalorder %s3614_s11, %s3614_s11 }
  0xd6   :  { %p3621_p8 = por %p3620_p7, %p3619_p6 }
  0xd8   :  { %p3622_p9 = pnand %p3621_p8, %p3615_p5 }
  0xda   :  { %3625 = shalt.err (!%p3622_p9)
}
  0xdb   :  { %115 = dma.hbm_to_vmem [thread:$0]  %s4538_s7, 32, %s4031_s3, [#allocation12], %s3758_s28, %s3758_s28, %s3759_s23  }
  0xdc   :  { %s3768_s30 = smov [#allocation16]   ;;  %s3769_s9 = smov [#allocation19]  }
  0xdd   :  { %s135_s21 = sshll.u32 %s3768_s30, 4  ;;  %s161_s24 = sshll.u32 %s3769_s9, 4  ;;  %s136_s21 = int_to_ptr.vmem [resolvable:$true] %s135_s21  ;;  %s4065_s24 = int_to_ptr.vmem [resolvable:$true] %s161_s24 }
  0xde   :  { %s3626_s6 = scalar_lea.hbm %s4541_s10, 32 }
  0xdf   :  { %p3627_p10 = scmp.ne.s32.totalorder %s4541_s10, %s3626_s6  ;;  %p3630_p11 = scmp.lt.u32.totalorder %s3626_s6, %s4541_s10 }
  0xe1   :  { %p3632_p12 = pnand %p3630_p11, %p3627_p10 }
  0xe3   :  { %3635 = shalt.err (!%p3632_p12)
}
  0xe4   :  { %s3636_s7 = scalar_lea.vmem %s136_s21, 32  ;;  %p3641_p0 = scmp.lt.s32.totalorder %s136_s21, %s136_s21 }
  0xe5   :  { %p3637_p13 = scmp.ne.s32.totalorder %s136_s21, %s3636_s7  ;;  %p3642_p1 = scmp.lt.s32.totalorder %s3636_s7, %s3636_s7 }
  0xe7   :  { %p3643_p2 = por %p3642_p1, %p3641_p0 }
  0xe9   :  { %p3644_p3 = pnand %p3643_p2, %p3637_p13 }
  0xeb   :  { %3647 = shalt.err (!%p3644_p3)
}
  0xec   :  { %141 = dma.hbm_to_vmem [thread:$0]  %s4541_s10, 32, %s136_s21, [#allocation15], %s3758_s28, %s3758_s28, %s3759_s23  }
  0xed   :  { %s3648_s2 = scalar_lea.hbm %s4544_s13, 32 }
  0xee   :  { %p3649_p4 = scmp.ne.s32.totalorder %s4544_s13, %s3648_s2  ;;  %p3652_p5 = scmp.lt.u32.totalorder %s3648_s2, %s4544_s13 }
  0xf0   :  { %p3654_p6 = pnand %p3652_p5, %p3649_p4 }
  0xf2   :  { %3657 = shalt.err (!%p3654_p6)
}
  0xf3   :  { %s3658_s9 = scalar_lea.vmem %s4065_s24, 32  ;;  %p3663_p8 = scmp.lt.s32.totalorder %s4065_s24, %s4065_s24 }
  0xf4   :  { %p3659_p7 = scmp.ne.s32.totalorder %s4065_s24, %s3658_s9  ;;  %p3664_p9 = scmp.lt.s32.totalorder %s3658_s9, %s3658_s9 }
  0xf6   :  { %p3665_p10 = por %p3664_p9, %p3663_p8 }
  0xf8   :  { %p3666_p11 = pnand %p3665_p10, %p3659_p7 }
  0xfa   :  { %3669 = shalt.err (!%p3666_p11)
}
  0xfb   :  { %167 = dma.hbm_to_vmem [thread:$0]  %s4544_s13, 32, %s4065_s24, [#allocation18], %s3758_s28, %s3758_s28, %s3759_s23  }
  0xfc   :  { %s3770_s5 = smov [#allocation22]   ;;  %s3771_s6 = smov [#allocation23]  }
  0xfd   :  { %s187_s4 = sshll.u32 %s3770_s5, 4  ;;  %s199_s0 = sshll.u32 %s3771_s6, 4  ;;  %s188_s4 = int_to_ptr.vmem [resolvable:$true] %s187_s4  ;;  %s4102_s0 = int_to_ptr.vmem [resolvable:$true] %s199_s0 }
  0xfe   :  { %s3670_s22 = scalar_lea.hbm %s4547_s16, 32 }
  0xff   :  { %p3671_p12 = scmp.ne.s32.totalorder %s4547_s16, %s3670_s22  ;;  %p3674_p13 = scmp.lt.u32.totalorder %s3670_s22, %s4547_s16 }
 0x101   :  { %p3676_p0 = pnand %p3674_p13, %p3671_p12 }
 0x103   :  { %3679 = shalt.err (!%p3676_p0)
}
 0x104   :  { %s3680_s13 = scalar_lea.vmem %s188_s4, 32  ;;  %p3685_p2 = scmp.lt.s32.totalorder %s188_s4, %s188_s4 }
 0x105   :  { %p3681_p1 = scmp.ne.s32.totalorder %s188_s4, %s3680_s13  ;;  %p3686_p3 = scmp.lt.s32.totalorder %s3680_s13, %s3680_s13 }
 0x107   :  { %p3687_p4 = por %p3686_p3, %p3685_p2 }
 0x109   :  { %p3688_p5 = pnand %p3687_p4, %p3681_p1 }
 0x10b   :  { %3691 = shalt.err (!%p3688_p5)
}
 0x10c   :  { %193 = dma.hbm_to_vmem [thread:$0]  %s4547_s16, 32, %s188_s4, [#allocation21], %s3758_s28, %s3758_s28, %s3759_s23  }
 0x10d   :  { %s3692_s1 = scalar_lea.hbm %s4548_s17, 32 }
 0x10e   :  { %p3693_p6 = scmp.ne.s32.totalorder %s4548_s17, %s3692_s1  ;;  %p3696_p7 = scmp.lt.u32.totalorder %s3692_s1, %s4548_s17 }
 0x110   :  { %p3698_p8 = pnand %p3696_p7, %p3693_p6 }
 0x112   :  { %3701 = shalt.err (!%p3698_p8)
}
 0x113   :  { %s3702_s21 = scalar_lea.vmem %s4102_s0, 32  ;;  %p3707_p10 = scmp.lt.s32.totalorder %s4102_s0, %s4102_s0 }
 0x114   :  { %p3703_p9 = scmp.ne.s32.totalorder %s4102_s0, %s3702_s21  ;;  %p3708_p11 = scmp.lt.s32.totalorder %s3702_s21, %s3702_s21 }
 0x116   :  { %p3709_p12 = por %p3708_p11, %p3707_p10 }
 0x118   :  { %p3710_p13 = pnand %p3709_p12, %p3703_p9 }
 0x11a   :  { %3713 = shalt.err (!%p3710_p13)
}
 0x11b   :  { %205 = dma.hbm_to_vmem [thread:$0]  %s4548_s17, 32, %s4102_s0, [#allocation24], %s3758_s28, %s3758_s28, %s3759_s23  }
 0x11c   :  { %3736 = dma.done.wait [#allocation3], 256  }
 0x11d   :  { %3737 = vsyncadd [#allocation3], 4294967040 }
 0x11e   :  { %3738 = dma.done.wait [#allocation6], 384  }
 0x11f   :  { %3739 = vsyncadd [#allocation6], 4294966912 }
 0x120   :  { %3740 = dma.done.wait [#allocation9], 48  }
 0x121   :  { %3741 = vsyncadd [#allocation9], 4294967248 }
 0x122   :  { %3742 = dma.done.wait [#allocation12], 48  }
 0x123   :  { %3743 = vsyncadd [#allocation12], 4294967248 }
 0x124   :  { %3744 = dma.done.wait [#allocation15], 64  }
 0x125   :  { %3745 = vsyncadd [#allocation15], 4294967232 }
 0x126   :  { %3746 = dma.done.wait [#allocation18], 64  }
 0x127   :  { %3747 = vsyncadd [#allocation18], 4294967232 }
 0x128   :  { %3748 = dma.done.wait [#allocation21], 64  }
 0x129   :  { %3749 = vsyncadd [#allocation21], 4294967232 }
 0x12a   :  { %3750 = dma.done.wait [#allocation24], 32  }
 0x12b   :  { %3751 = vsyncadd [#allocation24], 4294967264  ;;  %v256_v0 = vld [vmem:[#allocation7] sm:$0xff]  ;;  %v259_v2 = vld [vmem:[#allocation5] sm:$0xff]  ;;  %vm267_vm0 = vcmask 261120   ;;  %s4582_s4 = sld [smem:[#allocation41_spill]] }
 0x12c   :  { %v257_v1 = vld [vmem:[#allocation2] sm:$0xff]  ;;  %v258_v4 = vld [vmem:[#allocation2 + $0x8] sm:$0xff]  ;;  %v260_v5 = vld [vmem:[#allocation5 + $0x8] sm:$0xff]  ;;  %v3772_v43 = vmov 0.0   ;;  %vm3773_vm1 = vmmov 0   ;;  %s3774_s3 = smov 96  }
 0x12d   :  { %v261_v3 = vadd.f32 %v259_v2, %v257_v1  ;;  %v262_v6 = vadd.f32 %v260_v5, %v258_v4  ;;  %v2837_v34 = vld [vmem:[#allocation10] ss:$0 sm:$0xff]  ;;  %v2838_v36 = vld [vmem:[#allocation11] ss:$0 sm:$0xff]  ;;  %3030 = vmatprep.subr.mxu1 %v3772_v43  ;;  %3032 = vmatprep.mubr.msk.f32.mxu1 %vm3773_vm1, %v3772_v43  ;;  %v2839_v44 = vld [vmem:[#allocation13] ss:$0 sm:$0xff] }
 0x12e   :  { %vm408_vm2 = vcmask 130048   ;;  %v4189_v52 = vld [vmem:[#allocation8] ss:$0 sm:$0xff]  ;;  %vm576_vm3 = vcmask 64512   ;;  %v4192_v57 = vld [vmem:[#allocation8 + $0x1] ss:$0 sm:$0xff] }
 0x12f   :  { %v263_v7 = vadd.f32 %v261_v3, %v256_v0  ;;  %v264_v8 = vadd.f32 %v262_v6, %v256_v0  ;;  %s3775_s26 = smov 64   ;;  %s3776_s15 = smov 80   ;;  %vm1350_vm4 = vcmask 523264   ;;  %vm2643_vm5 = vcmask 1040384  }
 0x130   :  { %s3777_s13 = smov 112   ;;  %s3778_s24 = smov 48  }
 0x131   :  { %v268_v9 = vsel %vm267_vm0, %v263_v7, 0.0  ;;  %v271_v10 = vsel %vm267_vm0, %v264_v8, 0.0  ;;  %v313_v21 = vld [vmem:[%s4582_s4] sm:$0xff]  ;;  %v314_v22 = vld [vmem:[%s4582_s4 + $0x8] sm:$0xff]  ;;  %v315_v23 = vld [vmem:[%s4582_s4 + $0x10] sm:$0xff]  ;;  %s4583_s6 = sld [smem:[#allocation42_spill]] }
 0x132   :  { %269 = vadd.xlane.f32.xlu0 %v268_v9  ;;  %v3225_v24 = vpack.c.bf16 %v314_v22, %v313_v21  ;;  %v316_v25 = vld [vmem:[%s4582_s4 + $0x18] sm:$0xff]  ;;  %s4584_s19 = sld [smem:[#allocation43_spill]] }
 0x133   :  { %v3229_v26 = vpack.c.bf16 %v316_v25, %v315_v23 }
 0x134   :  { %3226 = vmatprep.subr.bf16.mxu0 %v3225_v24 }
 0x135   :  { %3228 = vmatpush3.bf16.msra.mxu0 %v3225_v24 }
 0x136   :  { %272 = vadd.xlane.f32.xlu0 %v271_v10  ;;  %3230 = vmatprep.subr.bf16.mxu0 %v3229_v26 }
 0x139   :  { %3232 = vmatpush3.bf16.msra.mxu0 %v3229_v26 }
 0x13a   :  { %3040 = vmatprep.subr.mxu0 %v3772_v43 }
 0x1bf   :  { %v270_v11 = vpop.xlane.xlu0 %269 }
 0x1c0   :  { %v275_v12 = vmul.f32 0.03125, %v270_v11 }
 0x1c2   :  { %v277_v13 = vsub.f32 %v263_v7, %v275_v12 }
 0x1c3   :  { %v273_v14 = vpop.xlane.xlu0 %272 }
 0x1c4   :  { %v276_v15 = vmul.f32 0.03125, %v273_v14  ;;  %v279_v16 = vmul.f32 %v277_v13, %v277_v13 }
 0x1c6   :  { %v278_v17 = vsub.f32 %v264_v8, %v276_v15  ;;  %v281_v18 = vsel %vm267_vm0, %v279_v16, 0.0 }
 0x1c7   :  { %282 = vadd.xlane.f32.xlu1 %v281_v18 }
 0x1c8   :  { %v280_v19 = vmul.f32 %v278_v17, %v278_v17 }
 0x1ca   :  { %v284_v20 = vsel %vm267_vm0, %v280_v19, 0.0 }
 0x1cb   :  { %285 = vadd.xlane.f32.xlu1 %v284_v20 }
 0x254   :  { %v283_v27 = vpop.xlane.xlu1 %282 }
 0x255   :  { %v287_v28 = vmul.f32 0.03125, %v283_v27 }
 0x257   :  { %v289_v29 = vadd.f32 1e-12, %v287_v28 }
 0x258   :  { %v286_v30 = vpop.xlane.xlu1 %285 }
 0x259   :  { %3344 = vrsqrt.f32 %v289_v29  ;;  %v288_v31 = vmul.f32 0.03125, %v286_v30 }
 0x25b   :  { %v290_v32 = vadd.f32 1e-12, %v288_v31 }
 0x25d   :  { %3346 = vrsqrt.f32 %v290_v32 }
 0x263   :  { %v3345_v33 = vpop.eup %3344 }
 0x264   :  { %v293_v35 = vmul.f32 %v3345_v33, %v277_v13 }
 0x266   :  { %v301_v37 = vmul.f32 %v2837_v34, %v293_v35 }
 0x267   :  { %v3347_v38 = vpop.eup %3346 }
 0x268   :  { %v294_v39 = vmul.f32 %v3347_v38, %v278_v17  ;;  %v4155_v40 = vadd.f32 %v2838_v36, %v301_v37 }
 0x26a   :  { %v302_v41 = vmul.f32 %v2837_v34, %v294_v39  ;;  %3027 = vmatprep.mubr.msk.f32.mxu0 %vm267_vm0, %v4155_v40 }
 0x26c   :  { %v4159_v42 = vadd.f32 %v2838_v36, %v302_v41 }
 0x26e   :  { %3028 = vmatmul.mubr.msk.f32.vlgmr.msra.gmra.mrb[0].mxu0 %vm267_vm0, %v4159_v42 }
 0x26f   :  { %3042 = vmatprep.mubr.msk.f32.mxu0 %vm3773_vm1, %v3772_v43 }
 0x341   :  { %v3029_v45 = vpop.f32.mrb[0].mxu0 }
 0x342   :  { %v4169_v46 = vadd.f32 %v3029_v45, %v2839_v44  ;;  %v396_v47 = vpop.f32.mrb[1].mxu0 }
 0x343   :  { %v4171_v48 = vadd.f32 %v2839_v44, %v396_v47 }
 0x344   :  { %484 = vrot.lane.b32.xlu1 %v4169_v46, %s3774_s3 }
 0x345   :  { %406 = vrot.lane.b32.xlu0 %v4171_v48, %s3774_s3 }
 0x3b6   :  { %v485_v50 = vpop.permute.xlu1 %484 }
 0x3b7   :  { %v407_v49 = vpop.permute.xlu0 %406 }
 0x3b8   :  { %3031 = vmatpush3.xpose.msk.msra.mxu1 %vm408_vm2, %v407_v49 }
 0x3b9   :  { %3035 = vmatprep.subr.mxu1 %v3772_v43 }
 0x3bb   :  { %3033 = vmatmul.mubr.msk.f32.vlgmr.msra.gmra.mrb[0].mxu1 %vm408_vm2, %v4171_v48 }
 0x3bc   :  { %3036 = vmatpush3.xpose.msk.msra.mxu1 %vm408_vm2, %v485_v50  ;;  %3037 = vmatprep.mubr.msk.f32.mxu1 %vm3773_vm1, %v3772_v43 }
 0x3bd   :  { %3045 = vmatprep.subr.mxu1 %v3772_v43 }
 0x3bf   :  { %3038 = vmatmul.mubr.msk.f32.vlgmr.msra.gmra.mrb[2].mxu1 %vm408_vm2, %v4169_v46 }
 0x3c0   :  { %3047 = vmatprep.mubr.msk.f32.mxu1 %vm3773_vm1, %v3772_v43 }
 0x48e   :  { %v479_v51 = vpop.f32.mrb[0].mxu1 }
 0x48f   :  { %v560_v53 = vmul.f32 0.25, %v479_v51  ;;  %v3034_v54 = vpop.f32.mrb[1].mxu1 }
 0x491   :  { %v574_v55 = vadd.f32 %v4189_v52, %v560_v53 }
 0x492   :  { %v556_v56 = vpop.f32.mrb[2].mxu1 }
 0x493   :  { %v561_v58 = vmul.f32 0.25, %v556_v56  ;;  %v3039_v59 = vpop.f32.mrb[3].mxu1  ;;  %v577_v60 = vsel %vm576_vm3, %v574_v55, -inf }
 0x494   :  { %578 = vmax.xlane.f32.xlu1 %v577_v60  ;;  %v1095_v59 = vld [vmem:[%s4539_s8] sm:$0xff] }
 0x495   :  { %v575_v61 = vadd.f32 %v4192_v57, %v561_v58 }
 0x497   :  { %v580_v62 = vsel %vm576_vm3, %v575_v61, -inf }
 0x498   :  { %581 = vmax.xlane.f32.xlu0 %v580_v62  ;;  %v1098_v62 = vld [vmem:[%s4539_s8 + $0x18] sm:$0xff] }
 0x4a5   :  { %675 = vrot.lane.b32.xlu1 %v4169_v46, %s3775_s26 }
 0x4a9   :  { %753 = vrot.lane.b32.xlu1 %v4171_v48, %s3776_s15 }
 0x4ad   :  { %831 = vrot.lane.b32.xlu1 %v4169_v46, %s3776_s15 }
 0x4ae   :  { %599 = vrot.lane.b32.xlu0 %v4171_v48, %s3775_s26 }
 0x521   :  { %v579_v63 = vpop.xlane.xlu1 %578 }
 0x522   :  { %v583_v0 = vsub.f32 %v574_v55, %v579_v63 }
 0x524   :  { %v585_v1 = vmul.f32 1.442695, %v583_v0 }
 0x525   :  { %v676_v2 = vpop.permute.xlu1 %675  ;;  %v582_v3 = vpop.xlane.xlu0 %581 }
 0x526   :  { %3348 = vpow2.f32 %v585_v1  ;;  %v584_v4 = vsub.f32 %v575_v61, %v582_v3  ;;  %3046 = vmatpush3.msra.mxu1 %v676_v2  ;;  %v1097_v61 = vld [vmem:[%s4539_s8 + $0x10] sm:$0xff] }
 0x527   :  { %3055 = vmatprep.subr.mxu1 %v3772_v43  ;;  %v3237_v63 = vpack.c.bf16 %v1098_v62, %v1097_v61  ;;  %v1341_v61 = vld [vmem:[%s4545_s14 + $0x30] sm:$0xff]  ;;  %v1342_v62 = vld [vmem:[%s4545_s14 + $0x38] sm:$0xff] }
 0x528   :  { %v587_v5 = vmul.f32 1.442695, %v584_v4 }
 0x529   :  { %v600_v6 = vpop.permute.xlu0 %599  ;;  %v754_v11 = vpop.permute.xlu1 %753 }
 0x52a   :  { %3350 = vpow2.f32 %v587_v5  ;;  %3041 = vmatpush3.msra.mxu0 %v600_v6 }
 0x52b   :  { %3050 = vmatprep.subr.mxu0 %v3772_v43 }
 0x52d   :  { %v832_v12 = vpop.permute.xlu1 %831 }
 0x530   :  { %v3349_v7 = vpop.eup %3348 }
 0x531   :  { %v589_v8 = vsel %vm576_vm3, %v3349_v7, 0.0 }
 0x532   :  { %590 = vadd.xlane.f32.xlu0 %v589_v8  ;;  %v2856_v8 = vld [vmem:[#allocation14] ss:$0 sm:$0xff] }
 0x534   :  { %v3351_v9 = vpop.eup %3350 }
 0x535   :  { %v592_v10 = vsel %vm576_vm3, %v3351_v9, 0.0 }
 0x536   :  { %593 = vadd.xlane.f32.xlu1 %v592_v10 }
 0x547   :  { %829 = vrot.lane.b32.xlu1 %v4169_v46, %s3777_s13 }
 0x548   :  { %751 = vrot.lane.b32.xlu0 %v4171_v48, %s3777_s13 }
 0x5bf   :  { %v591_v13 = vpop.xlane.xlu0 %590 }
 0x5c0   :  { %3352 = vrcp.f32 %v591_v13 }
 0x5c3   :  { %v594_v14 = vpop.xlane.xlu1 %593  ;;  %v752_v19 = vpop.permute.xlu0 %751 }
 0x5c4   :  { %3354 = vrcp.f32 %v594_v14 }
 0x5c7   :  { %v830_v20 = vpop.permute.xlu1 %829 }
 0x5ca   :  { %v3353_v15 = vpop.eup %3352 }
 0x5cb   :  { %v596_v16 = vmul.f32 %v3353_v15, %v3349_v7 }
 0x5cd   :  { %3043 = vmatmul.mubr.msk.f32.vlgmr.msra.gmra.mrb[2].mxu0 %vm576_vm3, %v596_v16 }
 0x5ce   :  { %v3355_v17 = vpop.eup %3354  ;;  %3051 = vmatpush3.xpose.msk.msra.mxu0 %vm408_vm2, %v754_v11  ;;  %3052 = vmatprep.mubr.msk.f32.mxu0 %vm3773_vm1, %v3772_v43 }
 0x5cf   :  { %v598_v18 = vmul.f32 %v3355_v17, %v3351_v9  ;;  %3060 = vmatprep.subr.mxu0 %v3772_v43 }
 0x5d1   :  { %3048 = vmatmul.mubr.msk.f32.vlgmr.msra.gmra.mrb[4].mxu1 %vm576_vm3, %v598_v18  ;;  %3053 = vmatmul.mubr.msk.f32.vlgmr.msra.gmra.mrb[4].mxu0 %vm408_vm2, %v752_v19 }
 0x5d2   :  { %3056 = vmatpush3.xpose.msk.msra.mxu1 %vm408_vm2, %v832_v12  ;;  %3057 = vmatprep.mubr.msk.f32.mxu1 %vm3773_vm1, %v3772_v43 }
 0x5d3   :  { %3065 = vmatprep.subr.mxu1 %v3772_v43  ;;  %3062 = vmatprep.mubr.msk.f32.mxu0 %vm3773_vm1, %v3772_v43 }
 0x5d5   :  { %3058 = vmatmul.mubr.msk.f32.vlgmr.msra.gmra.mrb[6].mxu1 %vm408_vm2, %v830_v20 }
 0x5d6   :  { %3067 = vmatprep.mubr.msk.f32.mxu1 %vm3773_vm1, %v3772_v43 }
 0x6a0   :  { %v4229_v21 = vpop.f32.mrb[2].mxu0 }
 0x6a1   :  { %v3044_v22 = vpop.f32.mrb[3].mxu0 }
 0x6a4   :  { %v4231_v23 = vpop.f32.mrb[4].mxu1  ;;  %v825_v24 = vpop.f32.mrb[4].mxu0 }
 0x6a5   :  { %v907_v25 = vmul.f32 0.25, %v825_v24  ;;  %v3049_v26 = vpop.f32.mrb[5].mxu1  ;;  %v3054_v27 = vpop.f32.mrb[5].mxu0 }
 0x6a6   :  { %v1234_v26 = vld [vmem:[%s4543_s12 + $0x8] sm:$0xff] }
 0x6a7   :  { %v909_v28 = vadd.f32 %v4189_v52, %v907_v25 }
 0x6a8   :  { %v903_v29 = vpop.f32.mrb[6].mxu1 }
 0x6a9   :  { %v908_v30 = vmul.f32 0.25, %v903_v29  ;;  %v3059_v31 = vpop.f32.mrb[7].mxu1  ;;  %v911_v32 = vsel %vm576_vm3, %v909_v28, -inf  ;;  %v1236_v29 = vld [vmem:[%s4543_s12 + $0x18] sm:$0xff] }
 0x6aa   :  { %912 = vmax.xlane.f32.xlu0 %v911_v32 }
 0x6ab   :  { %v910_v33 = vadd.f32 %v4192_v57, %v908_v30 }
 0x6ad   :  { %v914_v34 = vsel %vm576_vm3, %v910_v33, -inf }
 0x6ae   :  { %915 = vmax.xlane.f32.xlu1 %v914_v34 }
 0x6bf   :  { %1009 = vrot.lane.b32.xlu1 %v4169_v46, %s3778_s24 }
 0x737   :  { %v913_v35 = vpop.xlane.xlu0 %912 }
 0x738   :  { %v917_v36 = vsub.f32 %v909_v28, %v913_v35  ;;  %v1235_v28 = vld [vmem:[%s4543_s12 + $0x10] sm:$0xff] }
 0x739   :  { %v3245_v30 = vpack.c.bf16 %v1236_v29, %v1235_v28 }
 0x73a   :  { %v919_v37 = vmul.f32 1.442695, %v917_v36 }
 0x73b   :  { %v916_v38 = vpop.xlane.xlu1 %915 }
 0x73c   :  { %3356 = vpow2.f32 %v919_v37  ;;  %v918_v39 = vsub.f32 %v910_v33, %v916_v38  ;;  %v2859_v38 = vld [vmem:[#allocation16] ss:$0 sm:$0xff] }
 0x73e   :  { %v921_v41 = vmul.f32 1.442695, %v918_v39 }
 0x73f   :  { %v1010_v44 = vpop.permute.xlu1 %1009 }
 0x740   :  { %3358 = vpow2.f32 %v921_v41  ;;  %3066 = vmatpush3.msra.mxu1 %v1010_v44  ;;  %v2860_v41 = vld [vmem:[#allocation17] ss:$0 sm:$0xff] }
 0x746   :  { %v3357_v45 = vpop.eup %3356 }
 0x747   :  { %v923_v47 = vsel %vm576_vm3, %v3357_v45, 0.0 }
 0x748   :  { %924 = vadd.xlane.f32.xlu0 %v923_v47 }
 0x74a   :  { %v3359_v49 = vpop.eup %3358 }
 0x74b   :  { %v926_v50 = vsel %vm576_vm3, %v3359_v49, 0.0 }
 0x74c   :  { %927 = vadd.xlane.f32.xlu0 %v926_v50 }
 0x762   :  { %933 = vrot.lane.b32.xlu0 %v4171_v48, %s3778_s24  ;;  %v1096_v48 = vld [vmem:[%s4539_s8 + $0x8] sm:$0xff] }
 0x763   :  { %v3233_v60 = vpack.c.bf16 %v1096_v48, %v1095_v59  ;;  %v1339_v59 = vld [vmem:[%s4545_s14 + $0x20] sm:$0xff]  ;;  %v1340_v48 = vld [vmem:[%s4545_s14 + $0x28] sm:$0xff] }
 0x7d5   :  { %v925_v46 = vpop.xlane.xlu0 %924 }
 0x7d6   :  { %3360 = vrcp.f32 %v925_v46 }
 0x7d9   :  { %v928_v51 = vpop.xlane.xlu0 %927 }
 0x7da   :  { %3362 = vrcp.f32 %v928_v51  ;;  %v1335_v51 = vld [vmem:[%s4545_s14] sm:$0xff] }
 0x7dd   :  { %v934_v53 = vpop.permute.xlu0 %933 }
 0x7de   :  { %3061 = vmatpush3.msra.mxu0 %v934_v53  ;;  %v1336_v53 = vld [vmem:[%s4545_s14 + $0x8] sm:$0xff] }
 0x7df   :  { %3234 = vmatprep.subr.bf16.mxu0 %v3233_v60 }
 0x7e0   :  { %v3361_v54 = vpop.eup %3360 }
 0x7e1   :  { %v930_v55 = vmul.f32 %v3361_v54, %v3357_v45  ;;  %v3249_v54 = vpack.c.bf16 %v1336_v53, %v1335_v51 }
 0x7e3   :  { %3063 = vmatmul.mubr.msk.f32.vlgmr.msra.gmra.mrb[6].mxu0 %vm576_vm3, %v930_v55  ;;  %v1337_v55 = vld [vmem:[%s4545_s14 + $0x10] sm:$0xff] }
 0x7e4   :  { %v3363_v56 = vpop.eup %3362  ;;  %3236 = vmatpush3.bf16.msra.mxu0 %v3233_v60  ;;  %v3257_v60 = vpack.c.bf16 %v1340_v48, %v1339_v59  ;;  %v2873_v48 = vld [vmem:[#allocation13 + $0x1] ss:$0 sm:$0xff] }
 0x7e5   :  { %v932_v58 = vmul.f32 %v3363_v56, %v3359_v49  ;;  %3238 = vmatprep.subr.bf16.mxu0 %v3237_v63  ;;  %v1338_v56 = vld [vmem:[%s4545_s14 + $0x18] sm:$0xff] }
 0x7e7   :  { %3068 = vmatmul.mubr.msk.f32.vlgmr.msra.gmra.mrb[8].mxu1 %vm576_vm3, %v932_v58  ;;  %v3253_v58 = vpack.c.bf16 %v1338_v56, %v1337_v55 }
 0x7e8   :  { %3240 = vmatpush3.bf16.msra.mxu0 %v3237_v63  ;;  %v3261_v63 = vpack.c.bf16 %v1342_v62, %v1341_v61 }
 0x7e9   :  { %3250 = vmatprep.subr.bf16.mxu0 %v3249_v54 }
 0x8b6   :  { %v1005_v0 = vpop.f32.mrb[6].mxu0 }
 0x8b7   :  { %1087 = vrot.lane.b32.xlu1 %v1005_v0, %s3758_s28  ;;  %v3064_v1 = vpop.f32.mrb[7].mxu0  ;;  %v2861_v0 = vld [vmem:[#allocation19] ss:$0 sm:$0xff] }
 0x8ba   :  { %v1081_v2 = vpop.f32.mrb[8].mxu1 }
 0x8bb   :  { %1089 = vrot.lane.b32.xlu1 %v1081_v2, %s3758_s28  ;;  %v3069_v3 = vpop.f32.mrb[9].mxu1 }
 0x929   :  { %v1088_v4 = vpop.permute.xlu1 %1087 }
 0x92a   :  { %v1093_v5 = vsel %vm408_vm2, %v4229_v21, %v1088_v4 }
 0x92b   :  { %3078 = vmatprep.mubr.msk.f32.mxu0 %vm267_vm0, %v1093_v5 }
 0x92d   :  { %v1090_v6 = vpop.permute.xlu1 %1089 }
 0x92e   :  { %v1094_v7 = vsel %vm408_vm2, %v4231_v23, %v1090_v6 }
 0x92f   :  { %3079 = vmatmul.mubr.msk.f32.vlgmr.msra.gmra.mrb[8].mxu0 %vm267_vm0, %v1094_v7 }
 0x930   :  { %3252 = vmatpush3.bf16.msra.mxu0 %v3249_v54  ;;  %v2868_v54 = vld [vmem:[#allocation23] ss:$0 sm:$0xff] }
 0x931   :  { %3254 = vmatprep.subr.bf16.mxu0 %v3253_v58 }
 0x934   :  { %3256 = vmatpush3.bf16.msra.mxu0 %v3253_v58 }
 0x935   :  { %3258 = vmatprep.subr.bf16.mxu0 %v3257_v60 }
 0x938   :  { %3260 = vmatpush3.bf16.msra.mxu0 %v3257_v60 }
 0x939   :  { %3262 = vmatprep.subr.bf16.mxu0 %v3261_v63 }
 0x93c   :  { %3264 = vmatpush3.bf16.msra.mxu0 %v3261_v63 }
 0x93d   :  { %3132 = vmatprep.subr.mxu0 %v3772_v43 }
 0xa02   :  { %v3080_v9 = vpop.f32.mrb[8].mxu0 }
 0xa03   :  { %v1184_v10 = vadd.f32 %v3080_v9, %v2856_v8  ;;  %v1178_v11 = vpop.f32.mrb[9].mxu0 }
 0xa04   :  { %v1179_v12 = vadd.f32 %v2856_v8, %v1178_v11 }
 0xa05   :  { %v1188_v13 = vadd.f32 %v1184_v10, %v4159_v42 }
 0xa06   :  { %v1187_v14 = vadd.f32 %v1179_v12, %v4155_v40  ;;  %v1233_v40 = vld [vmem:[%s4543_s12] sm:$0xff] }
 0xa07   :  { %v1194_v15 = vsel %vm267_vm0, %v1188_v13, 0.0  ;;  %v3241_v27 = vpack.c.bf16 %v1234_v26, %v1233_v40 }
 0xa08   :  { %1195 = vadd.xlane.f32.xlu1 %v1194_v15  ;;  %v1191_v16 = vsel %vm267_vm0, %v1187_v14, 0.0  ;;  %v2864_v15 = vld [vmem:[#allocation20] ss:$0 sm:$0xff] }
 0xa09   :  { %1192 = vadd.xlane.f32.xlu0 %v1191_v16  ;;  %3242 = vmatprep.subr.bf16.mxu1 %v3241_v27 }
 0xa0a   :  { %3244 = vmatpush3.bf16.msra.mxu1 %v3241_v27 }
 0xa0b   :  { %3246 = vmatprep.subr.bf16.mxu1 %v3245_v30 }
 0xa0e   :  { %3248 = vmatpush3.bf16.msra.mxu1 %v3245_v30 }
 0xa95   :  { %v1196_v17 = vpop.xlane.xlu1 %1195 }
 0xa96   :  { %v1198_v18 = vmul.f32 0.03125, %v1196_v17  ;;  %v1193_v19 = vpop.xlane.xlu0 %1192 }
 0xa97   :  { %v1197_v20 = vmul.f32 0.03125, %v1193_v19 }
 0xa98   :  { %v1200_v21 = vsub.f32 %v1188_v13, %v1198_v18 }
 0xa99   :  { %v1199_v22 = vsub.f32 %v1187_v14, %v1197_v20 }
 0xa9a   :  { %v1202_v25 = vmul.f32 %v1200_v21, %v1200_v21 }
 0xa9b   :  { %v1201_v23 = vmul.f32 %v1199_v22, %v1199_v22 }
 0xa9c   :  { %v1206_v42 = vsel %vm267_vm0, %v1202_v25, 0.0 }
 0xa9d   :  { %v1203_v24 = vsel %vm267_vm0, %v1201_v23, 0.0 }
 0xa9e   :  { %1204 = vadd.xlane.f32.xlu0 %v1203_v24 }
 0xaa2   :  { %1207 = vadd.xlane.f32.xlu0 %v1206_v42 }
 0xb2b   :  { %v1205_v31 = vpop.xlane.xlu0 %1204 }
 0xb2c   :  { %v1209_v32 = vmul.f32 0.03125, %v1205_v31 }
 0xb2e   :  { %v1211_v33 = vadd.f32 1e-12, %v1209_v32  ;;  %v2869_v32 = vld [vmem:[%s4582_s4 + $0x20] sm:$0xff] }
 0xb2f   :  { %v1208_v34 = vpop.xlane.xlu0 %1207 }
 0xb30   :  { %3364 = vrsqrt.f32 %v1211_v33  ;;  %v1210_v35 = vmul.f32 0.03125, %v1208_v34  ;;  %v2870_v33 = vld [vmem:[%s4582_s4 + $0x28] sm:$0xff] }
 0xb31   :  { %v3265_v34 = vpack.c.bf16 %v2870_v33, %v2869_v32 }
 0xb32   :  { %v1212_v36 = vadd.f32 1e-12, %v1210_v35  ;;  %v2871_v35 = vld [vmem:[%s4582_s4 + $0x30] sm:$0xff] }
 0xb33   :  { %3266 = vmatprep.subr.bf16.mxu1 %v3265_v34 }
 0xb34   :  { %3366 = vrsqrt.f32 %v1212_v36  ;;  %v2872_v36 = vld [vmem:[%s4582_s4 + $0x38] sm:$0xff] }
 0xb3a   :  { %v3365_v37 = vpop.eup %3364 }
 0xb3b   :  { %v1215_v39 = vmul.f32 %v3365_v37, %v1199_v22  ;;  %v3269_v37 = vpack.c.bf16 %v2872_v36, %v2871_v35 }
 0xb3d   :  { %v1223_v44 = vmul.f32 %v2859_v38, %v1215_v39 }
 0xb3e   :  { %v3367_v45 = vpop.eup %3366 }
 0xb3f   :  { %v1216_v47 = vmul.f32 %v3367_v45, %v1200_v21  ;;  %v1231_v49 = vadd.f32 %v2860_v41, %v1223_v44 }
 0xb41   :  { %v1224_v50 = vmul.f32 %v2859_v38, %v1216_v47  ;;  %3089 = vmatprep.mubr.msk.f32.mxu1 %vm267_vm0, %v1231_v49 }
 0xb43   :  { %v1232_v46 = vadd.f32 %v2860_v41, %v1224_v50  ;;  %v2867_v50 = vld [vmem:[#allocation22] ss:$0 sm:$0xff] }
 0xb45   :  { %3090 = vmatmul.mubr.msk.f32.vlgmr.msra.gmra.mrb[10].mxu1 %vm267_vm0, %v1232_v46 }
 0xb46   :  { %3268 = vmatpush3.bf16.msra.mxu1 %v3265_v34 }
 0xb47   :  { %3270 = vmatprep.subr.bf16.mxu1 %v3269_v37 }
 0xb4a   :  { %3272 = vmatpush3.bf16.msra.mxu1 %v3269_v37 }
 0xb4b   :  { %3122 = vmatprep.subr.mxu1 %v3772_v43 }
 0xc18   :  { %v3091_v1 = vpop.f32.mrb[10].mxu1 }
 0xc19   :  { %v1322_v2 = vadd.f32 %v3091_v1, %v2861_v0  ;;  %v1316_v3 = vpop.f32.mrb[11].mxu1 }
 0xc1a   :  { %v1317_v4 = vadd.f32 %v2861_v0, %v1316_v3 }
 0xc1b   :  { %v1328_v5 = vmul.f32 0.70710677, %v1322_v2  ;;  %v1326_v12 = vmul.f32 0.5, %v1322_v2 }
 0xc1c   :  { %v1327_v6 = vmul.f32 0.70710677, %v1317_v4  ;;  %v1325_v10 = vmul.f32 0.5, %v1317_v4 }
 0xc1d   :  { %3368 = verf.f32 %v1328_v5 }
 0xc1e   :  { %3370 = verf.f32 %v1327_v6 }
 0xc27   :  { %v3369_v7 = vpop.eup %3368 }
 0xc28   :  { %v3371_v8 = vpop.eup %3370  ;;  %v1332_v9 = vadd.f32 1.0, %v3369_v7 }
 0xc29   :  { %v1331_v11 = vadd.f32 1.0, %v3371_v8 }
 0xc2a   :  { %v1334_v14 = vmul.f32 %v1332_v9, %v1326_v12 }
 0xc2b   :  { %v1333_v13 = vmul.f32 %v1331_v11, %v1325_v10 }
 0xc2d   :  { %3108 = vmatprep.mubr.msk.f32.mxu0 %vm1350_vm4, %v1333_v13 }
 0xc2e   :  { %3109 = vmatmul.mubr.msk.f32.vlgmr.msra.gmra.mrb[10].mxu0 %vm1350_vm4, %v1334_v14 }
 0xc2f   :  { %3134 = vmatprep.mubr.msk.f32.mxu0 %vm3773_vm1, %v3772_v43 }
 0xd01   :  { %v3110_v16 = vpop.f32.mrb[10].mxu0 }
 0xd02   :  { %v1429_v17 = vadd.f32 %v3110_v16, %v2864_v15  ;;  %v1423_v18 = vpop.f32.mrb[11].mxu0 }
 0xd03   :  { %v1424_v19 = vadd.f32 %v2864_v15, %v1423_v18 }
 0xd04   :  { %v1433_v20 = vadd.f32 %v1429_v17, %v1232_v46 }
 0xd05   :  { %v1432_v21 = vadd.f32 %v1424_v19, %v1231_v49 }
 0xd06   :  { %v1439_v22 = vsel %vm267_vm0, %v1433_v20, 0.0 }
 0xd07   :  { %1440 = vadd.xlane.f32.xlu1 %v1439_v22  ;;  %v1436_v23 = vsel %vm267_vm0, %v1432_v21, 0.0 }
 0xd08   :  { %1437 = vadd.xlane.f32.xlu0 %v1436_v23 }
 0xd94   :  { %v1441_v24 = vpop.xlane.xlu1 %1440 }
 0xd95   :  { %v1443_v25 = vmul.f32 0.03125, %v1441_v24  ;;  %v1438_v42 = vpop.xlane.xlu0 %1437 }
 0xd96   :  { %v1442_v40 = vmul.f32 0.03125, %v1438_v42 }
 0xd97   :  { %v1445_v26 = vsub.f32 %v1433_v20, %v1443_v25 }
 0xd98   :  { %v1444_v27 = vsub.f32 %v1432_v21, %v1442_v40 }
 0xd99   :  { %v1447_v28 = vmul.f32 %v1445_v26, %v1445_v26 }
 0xd9a   :  { %v1446_v29 = vmul.f32 %v1444_v27, %v1444_v27 }
 0xd9b   :  { %v1451_v30 = vsel %vm267_vm0, %v1447_v28, 0.0 }
 0xd9c   :  { %1452 = vadd.xlane.f32.xlu1 %v1451_v30  ;;  %v1448_v31 = vsel %vm267_vm0, %v1446_v29, 0.0 }
 0xd9d   :  { %1449 = vadd.xlane.f32.xlu0 %v1448_v31 }
 0xe29   :  { %v1453_v38 = vpop.xlane.xlu1 %1452 }
 0xe2a   :  { %v1455_v39 = vmul.f32 0.03125, %v1453_v38  ;;  %v1450_v41 = vpop.xlane.xlu0 %1449 }
 0xe2b   :  { %v1454_v44 = vmul.f32 0.03125, %v1450_v41 }
 0xe2c   :  { %v1457_v45 = vadd.f32 1e-12, %v1455_v39 }
 0xe2d   :  { %v1456_v47 = vadd.f32 1e-12, %v1454_v44 }
 0xe2e   :  { %3372 = vrsqrt.f32 %v1457_v45 }
 0xe2f   :  { %3374 = vrsqrt.f32 %v1456_v47 }
 0xe38   :  { %v3373_v49 = vpop.eup %3372 }
 0xe39   :  { %v3375_v46 = vpop.eup %3374  ;;  %v1461_v51 = vmul.f32 %v3373_v49, %v1445_v26 }
 0xe3a   :  { %v1460_v53 = vmul.f32 %v3375_v46, %v1444_v27 }
 0xe3b   :  { %v1469_v55 = vmul.f32 %v2867_v50, %v1461_v51 }
 0xe3c   :  { %v1468_v56 = vmul.f32 %v2867_v50, %v1460_v53 }
 0xe3d   :  { %v4333_v59 = vadd.f32 %v2868_v54, %v1469_v55 }
 0xe3e   :  { %v4331_v58 = vadd.f32 %v2868_v54, %v1468_v56 }
 0xe40   :  { %3119 = vmatprep.mubr.msk.f32.mxu1 %vm267_vm0, %v4331_v58 }
 0xe41   :  { %3120 = vmatmul.mubr.msk.f32.vlgmr.msra.gmra.mrb[12].mxu1 %vm267_vm0, %v4333_v59 }
 0xe42   :  { %3124 = vmatprep.mubr.msk.f32.mxu1 %vm3773_vm1, %v3772_v43 }
 0xf14   :  { %v3121_v60 = vpop.f32.mrb[12].mxu1 }
 0xf15   :  { %v4341_v61 = vadd.f32 %v3121_v60, %v2873_v48  ;;  %v1563_v62 = vpop.f32.mrb[13].mxu1 }
 0xf16   :  { %v4343_v63 = vadd.f32 %v2873_v48, %v1563_v62 }
 0xf17   :  { %1650 = vrot.lane.b32.xlu1 %v4341_v61, %s3774_s3 }
 0xf18   :  { %1573 = vrot.lane.b32.xlu0 %v4343_v63, %s3774_s3 }
 0xf89   :  { %v1651_v1 = vpop.permute.xlu1 %1650 }
 0xf8a   :  { %v1574_v0 = vpop.permute.xlu0 %1573 }
 0xf8b   :  { %3123 = vmatpush3.xpose.msk.msra.mxu1 %vm408_vm2, %v1574_v0 }
 0xf8c   :  { %3127 = vmatprep.subr.mxu1 %v3772_v43 }
 0xf8e   :  { %3125 = vmatmul.mubr.msk.f32.vlgmr.msra.gmra.mrb[14].mxu1 %vm408_vm2, %v4343_v63 }
 0xf8f   :  { %3128 = vmatpush3.xpose.msk.msra.mxu1 %vm408_vm2, %v1651_v1  ;;  %3129 = vmatprep.mubr.msk.f32.mxu1 %vm3773_vm1, %v3772_v43 }
 0xf90   :  { %3137 = vmatprep.subr.mxu1 %v3772_v43 }
 0xf92   :  { %3130 = vmatmul.mubr.msk.f32.vlgmr.msra.gmra.mrb[16].mxu1 %vm408_vm2, %v4341_v61 }
 0xf93   :  { %3139 = vmatprep.mubr.msk.f32.mxu1 %vm3773_vm1, %v3772_v43 }
0x1061   :  { %v1645_v2 = vpop.f32.mrb[14].mxu1 }
0x1062   :  { %v1726_v3 = vmul.f32 0.25, %v1645_v2  ;;  %v3126_v4 = vpop.f32.mrb[15].mxu1 }
0x1064   :  { %v1728_v5 = vadd.f32 %v4189_v52, %v1726_v3 }
0x1065   :  { %v1722_v6 = vpop.f32.mrb[16].mxu1 }
0x1066   :  { %v1727_v7 = vmul.f32 0.25, %v1722_v6  ;;  %v3131_v8 = vpop.f32.mrb[17].mxu1  ;;  %v1730_v9 = vsel %vm576_vm3, %v1728_v5, -inf  ;;  %v2888_v6 = vld [vmem:[%s4539_s8 + $0x20] sm:$0xff] }
0x1067   :  { %1731 = vmax.xlane.f32.xlu1 %v1730_v9  ;;  %v2890_v8 = vld [vmem:[%s4539_s8 + $0x30] sm:$0xff]  ;;  %v2891_v9 = vld [vmem:[%s4539_s8 + $0x38] sm:$0xff] }
0x1068   :  { %v1729_v10 = vadd.f32 %v4192_v57, %v1727_v7 }
0x106a   :  { %v1733_v11 = vsel %vm576_vm3, %v1729_v10, -inf }
0x106b   :  { %1734 = vmax.xlane.f32.xlu0 %v1733_v11 }
0x1078   :  { %1828 = vrot.lane.b32.xlu1 %v4341_v61, %s3775_s26 }
0x107c   :  { %1906 = vrot.lane.b32.xlu1 %v4343_v63, %s3776_s15 }
0x1080   :  { %1984 = vrot.lane.b32.xlu1 %v4341_v61, %s3776_s15 }
0x1081   :  { %1752 = vrot.lane.b32.xlu0 %v4343_v63, %s3775_s26 }
0x10f4   :  { %v1732_v12 = vpop.xlane.xlu1 %1731 }
0x10f5   :  { %v1736_v13 = vsub.f32 %v1728_v5, %v1732_v12 }
0x10f7   :  { %v1738_v14 = vmul.f32 1.442695, %v1736_v13 }
0x10f8   :  { %v1829_v15 = vpop.permute.xlu1 %1828  ;;  %v1735_v16 = vpop.xlane.xlu0 %1734 }
0x10f9   :  { %3376 = vpow2.f32 %v1738_v14  ;;  %v1737_v17 = vsub.f32 %v1729_v10, %v1735_v16  ;;  %3138 = vmatpush3.msra.mxu1 %v1829_v15  ;;  %v3277_v10 = vpack.c.bf16 %v2891_v9, %v2890_v8  ;;  %v2901_v9 = vld [vmem:[#allocation19 + $0x1] ss:$0 sm:$0xff] }
0x10fa   :  { %3147 = vmatprep.subr.mxu1 %v3772_v43 }
0x10fb   :  { %v1740_v18 = vmul.f32 1.442695, %v1737_v17 }
0x10fc   :  { %v1753_v19 = vpop.permute.xlu0 %1752  ;;  %v1907_v24 = vpop.permute.xlu1 %1906 }
0x10fd   :  { %3378 = vpow2.f32 %v1740_v18  ;;  %3133 = vmatpush3.msra.mxu0 %v1753_v19  ;;  %v2892_v19 = vld [vmem:[#allocation14 + $0x1] ss:$0 sm:$0xff] }
0x10fe   :  { %3142 = vmatprep.subr.mxu0 %v3772_v43 }
0x1100   :  { %v1985_v25 = vpop.permute.xlu1 %1984 }
0x1103   :  { %v3377_v20 = vpop.eup %3376 }
0x1104   :  { %v1742_v21 = vsel %vm576_vm3, %v3377_v20, 0.0 }
0x1105   :  { %1743 = vadd.xlane.f32.xlu0 %v1742_v21 }
0x1107   :  { %v3379_v22 = vpop.eup %3378 }
0x1108   :  { %v1745_v23 = vsel %vm576_vm3, %v3379_v22, 0.0 }
0x1109   :  { %1746 = vadd.xlane.f32.xlu1 %v1745_v23 }
0x111a   :  { %1982 = vrot.lane.b32.xlu1 %v4341_v61, %s3777_s13 }
0x111b   :  { %1904 = vrot.lane.b32.xlu0 %v4343_v63, %s3777_s13 }
0x1192   :  { %v1744_v42 = vpop.xlane.xlu0 %1743 }
0x1193   :  { %3380 = vrcp.f32 %v1744_v42 }
0x1196   :  { %v1747_v40 = vpop.xlane.xlu1 %1746  ;;  %v1905_v30 = vpop.permute.xlu0 %1904 }
0x1197   :  { %3382 = vrcp.f32 %v1747_v40 }
0x119a   :  { %v1983_v31 = vpop.permute.xlu1 %1982 }
0x119d   :  { %v3381_v26 = vpop.eup %3380 }
0x119e   :  { %v1749_v27 = vmul.f32 %v3381_v26, %v3377_v20 }
0x11a0   :  { %3135 = vmatmul.mubr.msk.f32.vlgmr.msra.gmra.mrb[12].mxu0 %vm576_vm3, %v1749_v27 }
0x11a1   :  { %v3383_v28 = vpop.eup %3382  ;;  %3143 = vmatpush3.xpose.msk.msra.mxu0 %vm408_vm2, %v1907_v24  ;;  %3144 = vmatprep.mubr.msk.f32.mxu0 %vm3773_vm1, %v3772_v43 }
0x11a2   :  { %v1751_v29 = vmul.f32 %v3383_v28, %v3379_v22  ;;  %3152 = vmatprep.subr.mxu0 %v3772_v43 }
0x11a4   :  { %3140 = vmatmul.mubr.msk.f32.vlgmr.msra.gmra.mrb[18].mxu1 %vm576_vm3, %v1751_v29  ;;  %3145 = vmatmul.mubr.msk.f32.vlgmr.msra.gmra.mrb[14].mxu0 %vm408_vm2, %v1905_v30 }
0x11a5   :  { %3148 = vmatpush3.xpose.msk.msra.mxu1 %vm408_vm2, %v1985_v25  ;;  %3149 = vmatprep.mubr.msk.f32.mxu1 %vm3773_vm1, %v3772_v43 }
0x11a6   :  { %3157 = vmatprep.subr.mxu1 %v3772_v43  ;;  %3154 = vmatprep.mubr.msk.f32.mxu0 %vm3773_vm1, %v3772_v43 }
0x11a8   :  { %3150 = vmatmul.mubr.msk.f32.vlgmr.msra.gmra.mrb[20].mxu1 %vm408_vm2, %v1983_v31 }
0x11a9   :  { %3159 = vmatprep.mubr.msk.f32.mxu1 %vm3773_vm1, %v3772_v43 }
0x1273   :  { %v4397_v32 = vpop.f32.mrb[12].mxu0 }
0x1274   :  { %v3136_v33 = vpop.f32.mrb[13].mxu0 }
0x1277   :  { %v4399_v34 = vpop.f32.mrb[18].mxu1  ;;  %v1978_v35 = vpop.f32.mrb[14].mxu0 }
0x1278   :  { %v2060_v36 = vmul.f32 0.25, %v1978_v35  ;;  %v3141_v37 = vpop.f32.mrb[19].mxu1  ;;  %v3146_v38 = vpop.f32.mrb[15].mxu0  ;;  %v2898_v35 = vld [vmem:[%s4543_s12 + $0x28] sm:$0xff] }
0x1279   :  { %v2899_v37 = vld [vmem:[%s4543_s12 + $0x30] sm:$0xff]  ;;  %v2900_v38 = vld [vmem:[%s4543_s12 + $0x38] sm:$0xff] }
0x127a   :  { %v2062_v39 = vadd.f32 %v4189_v52, %v2060_v36 }
0x127b   :  { %v2056_v41 = vpop.f32.mrb[20].mxu1 }
0x127c   :  { %v2061_v44 = vmul.f32 0.25, %v2056_v41  ;;  %v3151_v45 = vpop.f32.mrb[21].mxu1  ;;  %v2064_v47 = vsel %vm576_vm3, %v2062_v39, -inf }
0x127d   :  { %2065 = vmax.xlane.f32.xlu0 %v2064_v47 }
0x127e   :  { %v2063_v49 = vadd.f32 %v4192_v57, %v2061_v44 }
0x1280   :  { %v2067_v50 = vsel %vm576_vm3, %v2063_v49, -inf }
0x1281   :  { %2068 = vmax.xlane.f32.xlu1 %v2067_v50 }
0x1292   :  { %2162 = vrot.lane.b32.xlu1 %v4341_v61, %s3778_s24 }
0x130a   :  { %v2066_v46 = vpop.xlane.xlu0 %2065 }
0x130b   :  { %v2070_v51 = vsub.f32 %v2062_v39, %v2066_v46  ;;  %v3285_v39 = vpack.c.bf16 %v2900_v38, %v2899_v37 }
0x130d   :  { %v2072_v53 = vmul.f32 1.442695, %v2070_v51  ;;  %v2895_v51 = vld [vmem:[#allocation16 + $0x1] ss:$0 sm:$0xff] }
0x130e   :  { %v2069_v54 = vpop.xlane.xlu1 %2068 }
0x130f   :  { %3384 = vpow2.f32 %v2072_v53  ;;  %v2071_v52 = vsub.f32 %v2063_v49, %v2069_v54  ;;  %v2896_v54 = vld [vmem:[#allocation17 + $0x1] ss:$0 sm:$0xff] }
0x1311   :  { %v2074_v55 = vmul.f32 1.442695, %v2071_v52 }
0x1312   :  { %v2163_v56 = vpop.permute.xlu1 %2162 }
0x1313   :  { %3386 = vpow2.f32 %v2074_v55  ;;  %3158 = vmatpush3.msra.mxu1 %v2163_v56 }
0x1319   :  { %v3385_v48 = vpop.eup %3384 }
0x131a   :  { %v2076_v60 = vsel %vm576_vm3, %v3385_v48, 0.0 }
0x131b   :  { %2077 = vadd.xlane.f32.xlu0 %v2076_v60 }
0x131d   :  { %v3387_v57 = vpop.eup %3386 }
0x131e   :  { %v2079_v62 = vsel %vm576_vm3, %v3387_v57, 0.0 }
0x131f   :  { %2080 = vadd.xlane.f32.xlu0 %v2079_v62  ;;  %v2904_v62 = vld [vmem:[%s4545_s14 + $0x40] sm:$0xff] }
0x1335   :  { %2086 = vrot.lane.b32.xlu0 %v4343_v63, %s3778_s24  ;;  %v2889_v63 = vld [vmem:[%s4539_s8 + $0x28] sm:$0xff] }
0x1336   :  { %v3273_v7 = vpack.c.bf16 %v2889_v63, %v2888_v6  ;;  %v2910_v63 = vld [vmem:[%s4545_s14 + $0x70] sm:$0xff] }
0x13a8   :  { %v2078_v61 = vpop.xlane.xlu0 %2077 }
0x13a9   :  { %3388 = vrcp.f32 %v2078_v61  ;;  %v2905_v61 = vld [vmem:[%s4545_s14 + $0x48] sm:$0xff] }
0x13ac   :  { %v2081_v0 = vpop.xlane.xlu0 %2080 }
0x13ad   :  { %3390 = vrcp.f32 %v2081_v0  ;;  %v3289_v0 = vpack.c.bf16 %v2905_v61, %v2904_v62  ;;  %v2916_v61 = vld [vmem:[#allocation23 + $0x1] ss:$0 sm:$0xff] }
0x13b0   :  { %v2087_v1 = vpop.permute.xlu0 %2086 }
0x13b1   :  { %3153 = vmatpush3.msra.mxu0 %v2087_v1  ;;  %v2906_v1 = vld [vmem:[%s4545_s14 + $0x50] sm:$0xff] }
0x13b2   :  { %3274 = vmatprep.subr.bf16.mxu0 %v3273_v7 }
0x13b3   :  { %v3389_v2 = vpop.eup %3388 }
0x13b4   :  { %v2083_v3 = vmul.f32 %v3389_v2, %v3385_v48  ;;  %v2907_v2 = vld [vmem:[%s4545_s14 + $0x58] sm:$0xff] }
0x13b6   :  { %3155 = vmatmul.mubr.msk.f32.vlgmr.msra.gmra.mrb[16].mxu0 %vm576_vm3, %v2083_v3  ;;  %v3293_v3 = vpack.c.bf16 %v2907_v2, %v2906_v1 }
0x13b7   :  { %v3391_v4 = vpop.eup %3390  ;;  %3276 = vmatpush3.bf16.msra.mxu0 %v3273_v7  ;;  %v2911_v7 = vld [vmem:[%s4545_s14 + $0x78] sm:$0xff] }
0x13b8   :  { %v2085_v5 = vmul.f32 %v3391_v4, %v3387_v57  ;;  %3278 = vmatprep.subr.bf16.mxu0 %v3277_v10  ;;  %v2908_v4 = vld [vmem:[%s4545_s14 + $0x60] sm:$0xff]  ;;  %v3301_v8 = vpack.c.bf16 %v2911_v7, %v2910_v63  ;;  %v2731_v63 = vld [vmem:[%s4551_s20 + $0x8] sm:$0xff]  ;;  %v2732_v7 = vld [vmem:[%s4551_s20 + $0x10] sm:$0xff] }
0x13ba   :  { %3160 = vmatmul.mubr.msk.f32.vlgmr.msra.gmra.mrb[22].mxu1 %vm576_vm3, %v2085_v5  ;;  %v2909_v5 = vld [vmem:[%s4545_s14 + $0x68] sm:$0xff] }
0x13bb   :  { %3280 = vmatpush3.bf16.msra.mxu0 %v3277_v10  ;;  %v3297_v6 = vpack.c.bf16 %v2909_v5, %v2908_v4 }
0x13bc   :  { %3290 = vmatprep.subr.bf16.mxu0 %v3289_v0 }
0x1489   :  { %v2158_v11 = vpop.f32.mrb[16].mxu0 }
0x148a   :  { %2240 = vrot.lane.b32.xlu1 %v2158_v11, %s3758_s28  ;;  %v3156_v12 = vpop.f32.mrb[17].mxu0 }
0x148d   :  { %v2234_v13 = vpop.f32.mrb[22].mxu1 }
0x148e   :  { %2242 = vrot.lane.b32.xlu1 %v2234_v13, %s3758_s28  ;;  %v3161_v14 = vpop.f32.mrb[23].mxu1 }
0x14fc   :  { %v2241_v15 = vpop.permute.xlu1 %2240 }
0x14fd   :  { %v2246_v16 = vsel %vm408_vm2, %v4397_v32, %v2241_v15 }
0x14fe   :  { %3170 = vmatprep.mubr.msk.f32.mxu0 %vm267_vm0, %v2246_v16 }
0x1500   :  { %v2243_v17 = vpop.permute.xlu1 %2242 }
0x1501   :  { %v2247_v18 = vsel %vm408_vm2, %v4399_v34, %v2243_v17 }
0x1502   :  { %3171 = vmatmul.mubr.msk.f32.vlgmr.msra.gmra.mrb[18].mxu0 %vm267_vm0, %v2247_v18 }
0x1503   :  { %3292 = vmatpush3.bf16.msra.mxu0 %v3289_v0 }
0x1504   :  { %3294 = vmatprep.subr.bf16.mxu0 %v3293_v3 }
0x1507   :  { %3296 = vmatpush3.bf16.msra.mxu0 %v3293_v3 }
0x1508   :  { %3298 = vmatprep.subr.bf16.mxu0 %v3297_v6 }
0x150b   :  { %3300 = vmatpush3.bf16.msra.mxu0 %v3297_v6  ;;  %v2730_v6 = vld [vmem:[%s4551_s20] sm:$0xff] }
0x150c   :  { %3302 = vmatprep.subr.bf16.mxu0 %v3301_v8 }
0x150f   :  { %3304 = vmatpush3.bf16.msra.mxu0 %v3301_v8  ;;  %v3312_v8 = vpack.c.bf16 %v2731_v63, %v2730_v6 }
0x15d5   :  { %v3172_v20 = vpop.f32.mrb[18].mxu0 }
0x15d6   :  { %v2339_v21 = vadd.f32 %v3172_v20, %v2892_v19  ;;  %v2333_v22 = vpop.f32.mrb[19].mxu0 }
0x15d7   :  { %v2334_v23 = vadd.f32 %v2892_v19, %v2333_v22 }
0x15d8   :  { %v2343_v24 = vadd.f32 %v2339_v21, %v4333_v59 }
0x15d9   :  { %v2342_v25 = vadd.f32 %v2334_v23, %v4331_v58  ;;  %v2897_v58 = vld [vmem:[%s4543_s12 + $0x20] sm:$0xff] }
0x15da   :  { %v2351_v42 = vsel %vm267_vm0, %v2343_v24, 0.0  ;;  %v3281_v36 = vpack.c.bf16 %v2898_v35, %v2897_v58 }
0x15db   :  { %2352 = vadd.xlane.f32.xlu1 %v2351_v42  ;;  %v2348_v40 = vsel %vm267_vm0, %v2342_v25, 0.0 }
0x15dc   :  { %2349 = vadd.xlane.f32.xlu0 %v2348_v40  ;;  %3282 = vmatprep.subr.bf16.mxu1 %v3281_v36 }
0x15dd   :  { %3284 = vmatpush3.bf16.msra.mxu1 %v3281_v36 }
0x15de   :  { %3286 = vmatprep.subr.bf16.mxu1 %v3285_v39 }
0x15e1   :  { %3288 = vmatpush3.bf16.msra.mxu1 %v3285_v39  ;;  %v2645_v39 = vld [vmem:[%s4549_s18] sm:$0xff] }
0x1668   :  { %v2353_v26 = vpop.xlane.xlu1 %2352 }
0x1669   :  { %v2355_v27 = vmul.f32 0.03125, %v2353_v26  ;;  %v2350_v28 = vpop.xlane.xlu0 %2349 }
0x166a   :  { %v2354_v29 = vmul.f32 0.03125, %v2350_v28 }
0x166b   :  { %v2357_v30 = vsub.f32 %v2343_v24, %v2355_v27  ;;  %v2912_v24 = vld [vmem:[#allocation20 + $0x1] ss:$0 sm:$0xff] }
0x166c   :  { %v2356_v31 = vsub.f32 %v2342_v25, %v2354_v29 }
0x166d   :  { %v2359_v34 = vmul.f32 %v2357_v30, %v2357_v30 }
0x166e   :  { %v2358_v32 = vmul.f32 %v2356_v31, %v2356_v31 }
0x166f   :  { %v2363_v59 = vsel %vm267_vm0, %v2359_v34, 0.0 }
0x1670   :  { %v2360_v33 = vsel %vm267_vm0, %v2358_v32, 0.0 }
0x1671   :  { %2361 = vadd.xlane.f32.xlu0 %v2360_v33 }
0x1675   :  { %2364 = vadd.xlane.f32.xlu0 %v2363_v59 }
0x16fe   :  { %v2362_v41 = vpop.xlane.xlu0 %2361 }
0x16ff   :  { %v2366_v44 = vmul.f32 0.03125, %v2362_v41  ;;  %v2646_v41 = vld [vmem:[%s4549_s18 + $0x8] sm:$0xff] }
0x1701   :  { %v2368_v45 = vadd.f32 1e-12, %v2366_v44  ;;  %v3306_v44 = vpack.c.bf16 %v2646_v41, %v2645_v39 }
0x1702   :  { %v2365_v47 = vpop.xlane.xlu0 %2364 }
0x1703   :  { %3392 = vrsqrt.f32 %v2368_v45  ;;  %v2367_v49 = vmul.f32 0.03125, %v2365_v47  ;;  %v2647_v45 = vld [vmem:[%s4549_s18 + $0x10] sm:$0xff]  ;;  %v2648_v47 = vld [vmem:[%s4549_s18 + $0x18] sm:$0xff] }
0x1705   :  { %v2369_v50 = vadd.f32 1e-12, %v2367_v49  ;;  %v3779_v49 = vmov 0.0|0.0  }
0x1706   :  { %3305 = vmatprep.subr.bf16.mxu1 %v3779_v49 }
0x1707   :  { %3394 = vrsqrt.f32 %v2369_v50  ;;  %v3309_v50 = vpack.c.bf16 %v2648_v47, %v2647_v45 }
0x170d   :  { %v3393_v46 = vpop.eup %3392 }
0x170e   :  { %v2372_v53 = vmul.f32 %v3393_v46, %v2356_v31 }
0x1710   :  { %v2380_v52 = vmul.f32 %v2895_v51, %v2372_v53 }
0x1711   :  { %v3395_v55 = vpop.eup %3394 }
0x1712   :  { %v2373_v56 = vmul.f32 %v3395_v55, %v2357_v30  ;;  %v2388_v48 = vadd.f32 %v2896_v54, %v2380_v52 }
0x1714   :  { %v2381_v60 = vmul.f32 %v2895_v51, %v2373_v56  ;;  %3181 = vmatprep.mubr.msk.f32.mxu1 %vm267_vm0, %v2388_v48 }
0x1716   :  { %v2389_v57 = vadd.f32 %v2896_v54, %v2381_v60 }
0x1718   :  { %3182 = vmatmul.mubr.msk.f32.vlgmr.msra.gmra.mrb[24].mxu1 %vm267_vm0, %v2389_v57 }
0x1719   :  { %3211 = vmatprep.mubr.msk.f32.mxu1 %vm3773_vm1, %v3772_v43  ;;  %3307 = vmatpush3.bf16.msra.mxu1 %v3306_v44 }
0x171a   :  { %3308 = vmatprep.subr.bf16.mxu1 %v3779_v49 }
0x171d   :  { %3310 = vmatpush3.bf16.msra.mxu1 %v3309_v50 }
0x171e   :  { %3311 = vmatprep.subr.bf16.mxu1 %v3779_v49 }
0x17eb   :  { %v3183_v10 = vpop.f32.mrb[24].mxu1 }
0x17ec   :  { %v2481_v11 = vadd.f32 %v3183_v10, %v2901_v9  ;;  %v2475_v12 = vpop.f32.mrb[25].mxu1 }
0x17ed   :  { %v2476_v13 = vadd.f32 %v2901_v9, %v2475_v12  ;;  %v2733_v9 = vld [vmem:[%s4551_s20 + $0x18] sm:$0xff]  ;;  %s3780_s20 = smov [#allocation25]  }
0x17ee   :  { %v2487_v14 = vmul.f32 0.70710677, %v2481_v11  ;;  %v2485_v21 = vmul.f32 0.5, %v2481_v11  ;;  %v3315_v10 = vpack.c.bf16 %v2733_v9, %v2732_v7  ;;  %s2821_s22 = sshll.u32 %s3780_s20, 4  ;;  %s2822_s22 = int_to_ptr.vmem [resolvable:$true] %s2821_s22 }
0x17ef   :  { %v2486_v15 = vmul.f32 0.70710677, %v2476_v13  ;;  %v2484_v19 = vmul.f32 0.5, %v2476_v13  ;;  %s3714_s7 = scalar_lea.vmem %s2822_s22, 32  ;;  %p3719_p1 = scmp.lt.s32.totalorder %s2822_s22, %s2822_s22 }
0x17f0   :  { %3396 = verf.f32 %v2487_v14  ;;  %p3715_p0 = scmp.ne.s32.totalorder %s2822_s22, %s3714_s7  ;;  %p3720_p2 = scmp.lt.s32.totalorder %s3714_s7, %s3714_s7 }
0x17f1   :  { %3398 = verf.f32 %v2486_v15  ;;  %v2919_v15 = vld [vmem:[%s4584_s19] ss:$0 sm:$0xff] }
0x17f2   :  { %p3721_p3 = por %p3720_p2, %p3719_p1 }
0x17f4   :  { %p3722_p4 = pnand %p3721_p3, %p3715_p0 }
0x17fa   :  { %v3397_v16 = vpop.eup %3396 }
0x17fb   :  { %v3399_v17 = vpop.eup %3398  ;;  %v2491_v18 = vadd.f32 1.0, %v3397_v16 }
0x17fc   :  { %v2490_v20 = vadd.f32 1.0, %v3399_v17 }
0x17fd   :  { %v2493_v23 = vmul.f32 %v2491_v18, %v2485_v21 }
0x17fe   :  { %v2492_v22 = vmul.f32 %v2490_v20, %v2484_v19 }
0x1800   :  { %3200 = vmatprep.mubr.msk.f32.mxu0 %vm1350_vm4, %v2492_v22 }
0x1801   :  { %3201 = vmatmul.mubr.msk.f32.vlgmr.msra.gmra.mrb[20].mxu0 %vm1350_vm4, %v2493_v23 }
0x18d4   :  { %v3202_v25 = vpop.f32.mrb[20].mxu0 }
0x18d5   :  { %v2589_v42 = vadd.f32 %v3202_v25, %v2912_v24  ;;  %v2583_v40 = vpop.f32.mrb[21].mxu0 }
0x18d6   :  { %v2584_v26 = vadd.f32 %v2912_v24, %v2583_v40 }
0x18d7   :  { %v2593_v27 = vadd.f32 %v2589_v42, %v2389_v57 }
0x18d8   :  { %v2592_v28 = vadd.f32 %v2584_v26, %v2388_v48  ;;  %v2915_v48 = vld [vmem:[#allocation22 + $0x1] ss:$0 sm:$0xff] }
0x18d9   :  { %v2601_v29 = vsel %vm267_vm0, %v2593_v27, 0.0 }
0x18da   :  { %2602 = vadd.xlane.f32.xlu0 %v2601_v29  ;;  %v2598_v30 = vsel %vm267_vm0, %v2592_v28, 0.0 }
0x18db   :  { %2599 = vadd.xlane.f32.xlu1 %v2598_v30 }
0x1967   :  { %v2603_v31 = vpop.xlane.xlu0 %2602 }
0x1968   :  { %v2605_v32 = vmul.f32 0.03125, %v2603_v31  ;;  %v2600_v33 = vpop.xlane.xlu1 %2599 }
0x1969   :  { %v2604_v34 = vmul.f32 0.03125, %v2600_v33 }
0x196a   :  { %v2607_v59 = vsub.f32 %v2593_v27, %v2605_v32 }
0x196b   :  { %v2606_v58 = vsub.f32 %v2592_v28, %v2604_v34 }
0x196c   :  { %v2609_v35 = vmul.f32 %v2607_v59, %v2607_v59 }
0x196d   :  { %v2608_v36 = vmul.f32 %v2606_v58, %v2606_v58 }
0x196e   :  { %v2613_v37 = vsel %vm267_vm0, %v2609_v35, 0.0 }
0x196f   :  { %2614 = vadd.xlane.f32.xlu0 %v2613_v37  ;;  %v2610_v38 = vsel %vm267_vm0, %v2608_v36, 0.0 }
0x1970   :  { %2611 = vadd.xlane.f32.xlu1 %v2610_v38 }
0x19fc   :  { %v2615_v46 = vpop.xlane.xlu0 %2614 }
0x19fd   :  { %v2617_v51 = vmul.f32 0.03125, %v2615_v46  ;;  %v2612_v53 = vpop.xlane.xlu1 %2611 }
0x19fe   :  { %v2616_v54 = vmul.f32 0.03125, %v2612_v53 }
0x19ff   :  { %v2619_v52 = vadd.f32 1e-12, %v2617_v51 }
0x1a00   :  { %v2618_v55 = vadd.f32 1e-12, %v2616_v54 }
0x1a01   :  { %3400 = vrsqrt.f32 %v2619_v52 }
0x1a02   :  { %3402 = vrsqrt.f32 %v2618_v55 }
0x1a0b   :  { %v3401_v56 = vpop.eup %3400 }
0x1a0c   :  { %v3403_v60 = vpop.eup %3402  ;;  %v2623_v57 = vmul.f32 %v3401_v56, %v2607_v59 }
0x1a0d   :  { %v2622_v62 = vmul.f32 %v3403_v60, %v2606_v58 }
0x1a0e   :  { %v2631_v0 = vmul.f32 %v2915_v48, %v2623_v57 }
0x1a0f   :  { %v2630_v1 = vmul.f32 %v2915_v48, %v2622_v62 }
0x1a10   :  { %v2639_v2 = vadd.f32 %v2916_v61, %v2631_v0 }
0x1a11   :  { %v2638_v3 = vadd.f32 %v2916_v61, %v2630_v1 }
0x1a12   :  { %v2641_v4 = vrot.slane %v2639_v2, 7 }
0x1a14   :  { %v2644_v5 = vsel %vm2643_vm5, %v2638_v3, %v2641_v4 }
0x1a15   :  { %3212 = vmatmul.mubr.msk.f32.vlgmr.msra.gmra.mrb[26].mxu1 %vm267_vm0, %v2644_v5 }
0x1a16   :  { %3222 = vmatprep.mubr.msk.f32.mxu1 %vm3773_vm1, %v3772_v43  ;;  %3313 = vmatpush3.bf16.msra.mxu1 %v3312_v8  ;;  %v2917_v43 = vld [vmem:[%s4583_s6] ss:$0 sm:$0xff] }
0x1a17   :  { %3314 = vmatprep.subr.bf16.mxu1 %v3779_v49 }
0x1a1a   :  { %3316 = vmatpush3.bf16.msra.mxu1 %v3315_v10 }
0x1ae8   :  { %v2725_v11 = vpop.f32.mrb[26].mxu1 }
0x1ae9   :  { %v2726_v12 = vadd.f32 %v2917_v43, %v2725_v11  ;;  %v3213_v13 = vpop.f32.mrb[27].mxu1 }
0x1aeb   :  { %3404 = vtanh.f32 %v2726_v12 }
0x1af5   :  { %v3405_v14 = vpop.eup %3404 }
0x1af6   :  { %3223 = vmatmul.mubr.msk.f32.vlgmr.msra.gmra.mrb[28].mxu1 %vm267_vm0, %v3405_v14 }
0x1bc9   :  { %v2810_v16 = vpop.f32.mrb[28].mxu1 }
0x1bca   :  { %v2811_v17 = vadd.f32 %v2919_v15, %v2810_v16  ;;  %v3224_v18 = vpop.f32.mrb[29].mxu1 }
0x1bcc   :  { %2814 = vst [vmem:[#allocation25] sm:$0x3] %v2811_v17 }
0x1bcd   :  { %3725 = shalt.err (!%p3722_p4)
}
0x1bce   :  { %s4585_s4 = sld [smem:[#allocation44_spill]] }
0x1bd4   :  { %s3726_s3 = scalar_lea.hbm %s4585_s4, 32 }
0x1bd5   :  { %p3727_p5 = scmp.ne.s32.totalorder %s4585_s4, %s3726_s3  ;;  %p3730_p6 = scmp.lt.u32.totalorder %s3726_s3, %s4585_s4 }
0x1bd7   :  { %p3732_p7 = pnand %p3730_p6, %p3727_p5 }
0x1bd9   :  { %3735 = shalt.err (!%p3732_p7)
}
0x1bda   :  { %2824 = dma.vmem_to_hbm [thread:$0]  %s2822_s22, 32, %s4585_s4, [#allocation4]  }
0x1bdb   :  { %3752 = dma.done.wait [#allocation4], 32  }
0x1bdc   :  { %3753 = vsyncadd [#allocation4], 4294967264 }
0x1bdd   :  { %2828 = vsyncpa [#allocation3], 1 }
0x1bde   :  { %2829 = vsyncpa [#allocation6], 1 }
0x1bdf   :  { %2830 = vsyncpa [#allocation9], 1 }
0x1be0   :  { %2831 = vsyncpa [#allocation12], 1 }
0x1be1   :  { %2832 = vsyncpa [#allocation15], 1 }
0x1be2   :  { %2833 = vsyncpa [#allocation18], 1 }
0x1be3   :  { %2834 = vsyncpa [#allocation21], 1 }
0x1be4   :  { %2835 = vsyncpa [#allocation24], 1 }
0x1be5   :  { %2836 = vsyncpa [#allocation4], 1 }

</bundles_post_ra>
